<compile_context>
chip_gen: v6e
topology: v6e:2x2x1
jax: 0.10.0
libtpu: 0.0.40
codegen_flags: <defaults>
</compile_context>

<pallas_src>
import math
import jax
import jax.numpy as jnp
from jax import lax
from jax.experimental import pallas as pl
from jax.experimental.pallas import tpu as pltpu  # noqa: F401  (kept for TPU-specific tuning knobs)

B, T, S, H, NH, PF = 2, 8, 16, 32, 4, 64
HD = H // NH
BT, BS = B * T, B * S
SCALE = math.sqrt(HD)
EPS = 1e-5           # nn.LayerNorm default eps
NEG = -1e10          # masked_fill value in the PyTorch module

WCOLS = 3 * H        # 96  : widest packed row (self Q|K|V)
WROWS = 6 * H + PF   # 256 : six 32-row weight bands + one 64-row band (fc_2)


def decoder_layer_kernel(x_ref, mask_ref, w_ref, vec_ref, out_ref, attn_ref):
    xe = x_ref[...]                    # [BT+BS, H]  trg rows then enc rows
    x = xe[0:BT]                       # [BT, H]
    e = xe[BT:BT + BS]                 # [BS, H]

    mask = mask_ref[...]               # [BT, BT+BS] additive block-diagonal masks
    m_self = mask[:, 0:BT]             # [BT, BT]  causal + batch-block
    m_cross = mask[:, BT:BT + BS]      # [BT, BS]  padding + batch-block

    w = w_ref[...]                     # [WROWS, WCOLS] packed weights (32-row bands)
    w_qkv_s = w[0:H, 0:3 * H]          # self Q|K|V   (1/sqrt(HD) folded into Q)
    w_q_c = w[H:2 * H, 0:H]            # cross Q      (scale folded)
    w_kv_c = w[2 * H:3 * H, 0:2 * H]   # cross K|V
    w_o_s = w[3 * H:4 * H, 0:H]        # self  fc_o
    w_o_c = w[4 * H:5 * H, 0:H]        # cross fc_o
    w_f1 = w[5 * H:6 * H, 0:PF]        # ffn fc_1
    w_f2 = w[6 * H:6 * H + PF, 0:H]    # ffn fc_2

    vec = vec_ref[...]                 # [9, WCOLS] row-vector slab
    gamma = vec[0:1, 0:H]
    beta = vec[1:2, 0:H]
    b_qkv_s = vec[2:3, 0:3 * H]
    b_q_c = vec[3:4, 0:H]
    b_kv_c = vec[4:5, 0:2 * H]
    b_o_s = vec[5:6, 0:H]
    b_o_c = vec[6:7, 0:H]
    b_f1 = vec[7:8, 0:PF]
    b_f2 = vec[8:9, 0:H]

    def layer_norm(z):
        mu = jnp.mean(z, axis=-1, keepdims=True)
        var = jnp.mean((z - mu) ** 2, axis=-1, keepdims=True)
        return (z - mu) * lax.rsqrt(var + EPS) * gamma + beta

    def softmax_rows(energy):
        m = jnp.max(energy, axis=-1, keepdims=True)
        p = jnp.exp(energy - m)
        d = jnp.sum(p, axis=-1, keepdims=True)
        r = pl.reciprocal(d, approx=True)      # EUP slot (otherwise idle)
        r = r * (2.0 - d * r)                  # one Newton step -> full f32 accuracy
        return p * r

    def attention(q_all, kv_all, add_mask, wo, bo):
        # q_all [Tq, H]: heads concatenated along lanes (scale already folded in).
        # kv_all [Tk, 2H]: K in lanes 0:H, V in lanes H:2H.
        ctx_heads = []
        attn_heads = []
        for h in range(NH):                    # static unroll, NH = 4
            lo, hi = h * HD, (h + 1) * HD
            q_h = q_all[:, lo:hi]
            k_h = kv_all[:, lo:hi]
            v_h = kv_all[:, H + lo:H + hi]
            energy = jnp.einsum('td,sd->ts', q_h, k_h,
                                preferred_element_type=jnp.float32) + add_mask
            a_h = softmax_rows(energy)
            ctx_heads.append(jnp.dot(a_h, v_h, preferred_element_type=jnp.float32))
            attn_heads.append(a_h)
        ctx = jnp.concatenate(ctx_heads, axis=-1)          # [Tq, H] == "concat heads"
        out = jnp.dot(ctx, wo, preferred_element_type=jnp.float32) + bo
        return out, attn_heads

    # --- self attention + residual + shared LayerNorm (dropout = identity) ---
    qkv = jnp.dot(x, w_qkv_s, preferred_element_type=jnp.float32) + b_qkv_s   # [BT,3H]
    sa, _ = attention(qkv[:, 0:H], qkv[:, H:3 * H], m_self, w_o_s, b_o_s)
    x = layer_norm(x + sa)

    # --- encoder (cross) attention; attention probabilities are the 2nd output ---
    q_c = jnp.dot(x, w_q_c, preferred_element_type=jnp.float32) + b_q_c       # [BT, H]
    kv_c = jnp.dot(e, w_kv_c, preferred_element_type=jnp.float32) + b_kv_c    # [BS, 2H]
    ca, attn_heads = attention(q_c, kv_c, m_cross, w_o_c, b_o_c)
    for h in range(NH):
        attn_ref[h] = attn_heads[h]            # [BT, BS] per head; blocks split in wrapper
    x = layer_norm(x + ca)

    # --- positionwise feed-forward (RELU_FLAG=True -> relu) ---
    hdn = jnp.maximum(
        jnp.dot(x, w_f1, preferred_element_type=jnp.float32) + b_f1, 0.0)
    ff = jnp.dot(hdn, w_f2, preferred_element_type=jnp.float32) + b_f2
    out_ref[...] = layer_norm(x + ff)


def pack_params(params):
    """Host-side packing of the 22 PyTorch-layout params into 2 slabs."""
    (swq, sbq, swk, sbk, swv, sbv, swo, sbo,
     ewq, ebq, ewk, ebk, ewv, ebv, ewo, ebo,
     fw1, fb1, fw2, fb2, gamma, beta) = params
    inv = 1.0 / SCALE                      # fold 1/sqrt(head_dim) into Wq, bq

    w = jnp.zeros((WROWS, WCOLS), jnp.float32)
    w = w.at[0:H, 0:3 * H].set(jnp.concatenate([swq * inv, swk, swv], axis=1))
    w = w.at[H:2 * H, 0:H].set(ewq * inv)
    w = w.at[2 * H:3 * H, 0:2 * H].set(jnp.concatenate([ewk, ewv], axis=1))
    w = w.at[3 * H:4 * H, 0:H].set(swo)
    w = w.at[4 * H:5 * H, 0:H].set(ewo)
    w = w.at[5 * H:6 * H, 0:PF].set(fw1)
    w = w.at[6 * H:6 * H + PF, 0:H].set(fw2)

    v = jnp.zeros((9, WCOLS), jnp.float32)
    v = v.at[0, 0:H].set(gamma[0])
    v = v.at[1, 0:H].set(beta[0])
    v = v.at[2, 0:3 * H].set(jnp.concatenate([sbq[0] * inv, sbk[0], sbv[0]]))
    v = v.at[3, 0:H].set(ebq[0] * inv)
    v = v.at[4, 0:2 * H].set(jnp.concatenate([ebk[0], ebv[0]]))
    v = v.at[5, 0:H].set(sbo[0])
    v = v.at[6, 0:H].set(ebo[0])
    v = v.at[7, 0:PF].set(fb1[0])
    v = v.at[8, 0:H].set(fb2[0])
    return w, v


def pack_masks(trg_mask, src_mask):
    """Block-diagonal ADDITIVE masks (0 attend / -1e10 masked or other-batch)."""
    eye_b = jnp.eye(B, dtype=jnp.float32)
    keep_self = (eye_b[:, None, :, None] * trg_mask[:, :, None, :]).reshape(BT, BT)
    keep_cross = jnp.broadcast_to(
        eye_b[:, None, :, None] * src_mask[:, 0][:, None, None, :],
        (B, T, B, S)).reshape(BT, BS)
    m_self = jnp.where(keep_self == 0, NEG, 0.0).astype(jnp.float32)
    m_cross = jnp.where(keep_cross == 0, NEG, 0.0).astype(jnp.float32)
    return jnp.concatenate([m_self, m_cross], axis=1)       # [BT, BT+BS]


def decoder_layer(trg, enc_src, trg_mask, src_mask, params):
    w_slab, vec_slab = pack_params(params)
    mask_slab = pack_masks(trg_mask, src_mask)
    x_slab = jnp.concatenate(
        [trg.reshape(BT, H), enc_src.reshape(BS, H)], axis=0).astype(jnp.float32)

    # Single kernel step (no grid): whole arrays land in VMEM (<0.3 MiB total), so
    # grid-step overhead is paid once.  On v7x, an alternative is grid=(B,) with
    # dimension_semantics=("parallel",) to give each TensorCore one batch element.
    out2d, attn_full = pl.pallas_call(
        decoder_layer_kernel,
        out_shape=[jax.ShapeDtypeStruct((BT, H), jnp.float32),
                   jax.ShapeDtypeStruct((NH, BT, BS), jnp.float32)],
    )(x_slab, mask_slab, w_slab, vec_slab)

    out = out2d.reshape(B, T, H)
    # Extract the per-batch diagonal blocks of the block-structured cross attention
    # (pure layout plumbing, done wrapper-side): [NH, BT, BS] -> [B, NH, T, S].
    bidx = jnp.arange(B)
    attn = attn_full.reshape(NH, B, T, B, S)[:, bidx, :, bidx, :]
    return out, attn


def reference(trg, enc_src, trg_mask, src_mask, params):
    """Pure-JAX mirror of the PyTorch forward (for validation)."""
    (swq, sbq, swk, sbk, swv, sbv, swo, sbo,
     ewq, ebq, ewk, ebk, ewv, ebv, ewo, ebo,
     fw1, fb1, fw2, fb2, gamma, beta) = params

    def ln(x):
        mu = x.mean(-1, keepdims=True)
        var = ((x - mu) ** 2).mean(-1, keepdims=True)
        return (x - mu) / jnp.sqrt(var + EPS) * gamma[0] + beta[0]

    def mha(q, kv, mask, wq, bq, wk, bk, wv, bv, wo, bo):
        Q = q @ wq + bq[0]
        K = kv @ wk + bk[0]
        V = kv @ wv + bv[0]
        Bq, Tq, _ = Q.shape
        Tk = K.shape[1]
        Q = Q.reshape(Bq, Tq, NH, HD).transpose(0, 2, 1, 3)
        K = K.reshape(Bq, Tk, NH, HD).transpose(0, 2, 1, 3)
        V = V.reshape(Bq, Tk, NH, HD).transpose(0, 2, 1, 3)
        energy = jnp.einsum('bhtd,bhsd->bhts', Q, K) / SCALE
        energy = jnp.where(mask[:, None] == 0, NEG, energy)
        attn = jax.nn.softmax(energy, axis=-1)
        x = jnp.einsum('bhts,bhsd->bhtd', attn, V)
        x = x.transpose(0, 2, 1, 3).reshape(Bq, Tq, H)
        return x @ wo + bo[0], attn

    _t, _ = mha(trg, trg, trg_mask, swq, sbq, swk, sbk, swv, sbv, swo, sbo)
    t = ln(trg + _t)
    _t, attn = mha(t, enc_src, src_mask, ewq, ebq, ewk, ebk, ewv, ebv, ewo, ebo)
    t = ln(t + _t)
    _t = jnp.maximum(t @ fw1 + fb1[0], 0.0) @ fw2 + fb2[0]
    t = ln(t + _t)
    return t, attn


if __name__ == "__main__":
    key = jax.random.PRNGKey(0)
    ks = jax.random.split(key, 32)

    trg = jax.random.normal(ks[0], (B, T, H), jnp.float32)
    enc_src = jax.random.normal(ks[1], (B, S, H), jnp.float32)

    # causal target mask [B, T, T], padding source mask [B, 1, S]
    trg_mask = jnp.broadcast_to(
        jnp.tril(jnp.ones((T, T), jnp.float32)), (B, T, T))
    src_valid = jnp.stack([jnp.where(jnp.arange(S) < S, 1.0, 0.0),
                           jnp.where(jnp.arange(S) < S - 4, 1.0, 0.0)])
    src_mask = src_valid.reshape(B, 1, S).astype(jnp.float32)

    def w(k, shape, scale=0.05):
        return (scale * jax.random.normal(k, shape)).astype(jnp.float32)

    params = [
        # self attention: fc_q, fc_k, fc_v, fc_o  (stored as [in, out] + bias [1, out])
        w(ks[2], (H, H)), w(ks[3], (1, H)),
        w(ks[4], (H, H)), w(ks[5], (1, H)),
        w(ks[6], (H, H)), w(ks[7], (1, H)),
        w(ks[8], (H, H)), w(ks[9], (1, H)),
        # encoder attention: fc_q, fc_k, fc_v, fc_o
        w(ks[10], (H, H)), w(ks[11], (1, H)),
        w(ks[12], (H, H)), w(ks[13], (1, H)),
        w(ks[14], (H, H)), w(ks[15], (1, H)),
        w(ks[16], (H, H)), w(ks[17], (1, H)),
        # positionwise feedforward: fc_1, fc_2
        w(ks[18], (H, PF)), w(ks[19], (1, PF)),
        w(ks[20], (PF, H)), w(ks[21], (1, H)),
        # shared LayerNorm gamma / beta — randomized so the shared-LN wiring is exercised
        (1.0 + 0.1 * jax.random.normal(ks[22], (1, H))).astype(jnp.float32),
        (0.1 * jax.random.normal(ks[23], (1, H))).astype(jnp.float32),
    ]

    run = jax.jit(decoder_layer)
    out, attn = run(trg, enc_src, trg_mask, src_mask, params)
    jax.block_until_ready((out, attn))

    ref_out, ref_attn = reference(trg, enc_src, trg_mask, src_mask, params)
    assert jnp.allclose(out, ref_out, atol=1e-4, rtol=1e-4), "trg mismatch"
    assert jnp.allclose(attn, ref_attn, atol=1e-4, rtol=1e-4), "attention mismatch"

    print("KERNEL_OK")
</pallas_src>

<mosaic_0001>
module attributes {stable_mosaic.version = 11 : i64} {
  func.func @decoder_layer_kernel(%arg0: memref<48x32xf32, #tpu.memory_space<vmem>>, %arg1: memref<16x48xf32, #tpu.memory_space<vmem>>, %arg2: memref<256x96xf32, #tpu.memory_space<vmem>>, %arg3: memref<9x96xf32, #tpu.memory_space<vmem>>, %arg4: memref<16x32xf32, #tpu.memory_space<vmem>>, %arg5: memref<4x16x32xf32, #tpu.memory_space<vmem>>) attributes {dimension_semantics = [], scalar_prefetch = 0 : i64, scratch_operands = 0 : i64, tpu.core_type = #tpu.core_type<tc>} {
    %c0 = arith.constant 0 : index
    %c0_0 = arith.constant 0 : index
    %0 = vector.load %arg0[%c0, %c0_0] : memref<48x32xf32, #tpu.memory_space<vmem>>, vector<48x32xf32>
    %1 = vector.extract_strided_slice %0 {offsets = [0, 0], sizes = [16, 32], strides = [1, 1]} : vector<48x32xf32> to vector<16x32xf32>
    %2 = vector.extract_strided_slice %0 {offsets = [16, 0], sizes = [32, 32], strides = [1, 1]} : vector<48x32xf32> to vector<32x32xf32>
    %c0_1 = arith.constant 0 : index
    %c0_2 = arith.constant 0 : index
    %3 = vector.load %arg1[%c0_1, %c0_2] : memref<16x48xf32, #tpu.memory_space<vmem>>, vector<16x48xf32>
    %4 = vector.extract_strided_slice %3 {offsets = [0, 0], sizes = [16, 16], strides = [1, 1]} : vector<16x48xf32> to vector<16x16xf32>
    %5 = vector.extract_strided_slice %3 {offsets = [0, 16], sizes = [16, 32], strides = [1, 1]} : vector<16x48xf32> to vector<16x32xf32>
    %c0_3 = arith.constant 0 : index
    %c0_4 = arith.constant 0 : index
    %6 = vector.load %arg2[%c0_3, %c0_4] : memref<256x96xf32, #tpu.memory_space<vmem>>, vector<256x96xf32>
    %7 = vector.extract_strided_slice %6 {offsets = [0, 0], sizes = [32, 96], strides = [1, 1]} : vector<256x96xf32> to vector<32x96xf32>
    %8 = vector.extract_strided_slice %6 {offsets = [32, 0], sizes = [32, 32], strides = [1, 1]} : vector<256x96xf32> to vector<32x32xf32>
    %9 = vector.extract_strided_slice %6 {offsets = [64, 0], sizes = [32, 64], strides = [1, 1]} : vector<256x96xf32> to vector<32x64xf32>
    %10 = vector.extract_strided_slice %6 {offsets = [96, 0], sizes = [32, 32], strides = [1, 1]} : vector<256x96xf32> to vector<32x32xf32>
    %11 = vector.extract_strided_slice %6 {offsets = [128, 0], sizes = [32, 32], strides = [1, 1]} : vector<256x96xf32> to vector<32x32xf32>
    %12 = vector.extract_strided_slice %6 {offsets = [160, 0], sizes = [32, 64], strides = [1, 1]} : vector<256x96xf32> to vector<32x64xf32>
    %13 = vector.extract_strided_slice %6 {offsets = [192, 0], sizes = [64, 32], strides = [1, 1]} : vector<256x96xf32> to vector<64x32xf32>
    %c0_5 = arith.constant 0 : index
    %c0_6 = arith.constant 0 : index
    %14 = vector.load %arg3[%c0_5, %c0_6] : memref<9x96xf32, #tpu.memory_space<vmem>>, vector<9x96xf32>
    %15 = vector.extract_strided_slice %14 {offsets = [0, 0], sizes = [1, 32], strides = [1, 1]} : vector<9x96xf32> to vector<1x32xf32>
    %16 = vector.extract_strided_slice %14 {offsets = [1, 0], sizes = [1, 32], strides = [1, 1]} : vector<9x96xf32> to vector<1x32xf32>
    %17 = vector.extract_strided_slice %14 {offsets = [2, 0], sizes = [1, 96], strides = [1, 1]} : vector<9x96xf32> to vector<1x96xf32>
    %18 = vector.extract_strided_slice %14 {offsets = [3, 0], sizes = [1, 32], strides = [1, 1]} : vector<9x96xf32> to vector<1x32xf32>
    %19 = vector.extract_strided_slice %14 {offsets = [4, 0], sizes = [1, 64], strides = [1, 1]} : vector<9x96xf32> to vector<1x64xf32>
    %20 = vector.extract_strided_slice %14 {offsets = [5, 0], sizes = [1, 32], strides = [1, 1]} : vector<9x96xf32> to vector<1x32xf32>
    %21 = vector.extract_strided_slice %14 {offsets = [6, 0], sizes = [1, 32], strides = [1, 1]} : vector<9x96xf32> to vector<1x32xf32>
    %22 = vector.extract_strided_slice %14 {offsets = [7, 0], sizes = [1, 64], strides = [1, 1]} : vector<9x96xf32> to vector<1x64xf32>
    %23 = vector.extract_strided_slice %14 {offsets = [8, 0], sizes = [1, 32], strides = [1, 1]} : vector<9x96xf32> to vector<1x32xf32>
    %cst = arith.constant dense<0.000000e+00> : vector<16x96xf32>
    %24 = tpu.matmul %1, %7, %cst {dimension_numbers = #tpu.dot_dimension_numbers<[1], [0], [0], [1], [0, 0, 1, 1], [], []>} : vector<16x32xf32>, vector<32x96xf32>, vector<16x96xf32> -> vector<16x96xf32>
    %25 = vector.broadcast %17 : vector<1x96xf32> to vector<16x96xf32>
    %26 = arith.addf %24, %25 : vector<16x96xf32>
    %27 = vector.extract_strided_slice %26 {offsets = [0, 0], sizes = [16, 32], strides = [1, 1]} : vector<16x96xf32> to vector<16x32xf32>
    %28 = vector.extract_strided_slice %26 {offsets = [0, 32], sizes = [16, 64], strides = [1, 1]} : vector<16x96xf32> to vector<16x64xf32>
    %29 = vector.extract_strided_slice %27 {offsets = [0, 0], sizes = [16, 8], strides = [1, 1]} : vector<16x32xf32> to vector<16x8xf32>
    %30 = vector.extract_strided_slice %28 {offsets = [0, 0], sizes = [16, 8], strides = [1, 1]} : vector<16x64xf32> to vector<16x8xf32>
    %31 = vector.extract_strided_slice %28 {offsets = [0, 32], sizes = [16, 8], strides = [1, 1]} : vector<16x64xf32> to vector<16x8xf32>
    "tpu.trace_start"() <{level = 10 : i32, message = "td,sd->ts"}> : () -> ()
    %cst_7 = arith.constant dense<0.000000e+00> : vector<16x16xf32>
    %32 = tpu.matmul %29, %30, %cst_7 {dimension_numbers = #tpu.dot_dimension_numbers<[1], [1], [0], [0], [0, 0, 1, 0], [], []>} : vector<16x8xf32>, vector<16x8xf32>, vector<16x16xf32> -> vector<16x16xf32>
    "tpu.trace_stop"() : () -> ()
    %33 = arith.addf %32, %4 : vector<16x16xf32>
    %cst_8 = arith.constant dense<0xFF800000> : vector<16xf32>
    %34 = vector.multi_reduction <maximumf>, %33, %cst_8 [1] : vector<16x16xf32> to vector<16xf32>
    %35 = vector.shape_cast %34 : vector<16xf32> to vector<16x1xf32>
    %36 = vector.broadcast %35 : vector<16x1xf32> to vector<16x16xf32>
    %37 = arith.subf %33, %36 : vector<16x16xf32>
    %38 = math.exp %37 : vector<16x16xf32>
    %cst_9 = arith.constant dense<0.000000e+00> : vector<16xf32>
    %39 = vector.multi_reduction <add>, %38, %cst_9 [1] : vector<16x16xf32> to vector<16xf32>
    %40 = vector.shape_cast %39 : vector<16xf32> to vector<16x1xf32>
    %41 = tpu.reciprocal %40 {approx = true} : vector<16x1xf32> -> vector<16x1xf32>
    %42 = arith.mulf %40, %41 : vector<16x1xf32>
    %cst_10 = arith.constant 2.000000e+00 : f32
    %43 = vector.broadcast %cst_10 : f32 to vector<16x1xf32>
    %44 = arith.subf %43, %42 : vector<16x1xf32>
    %45 = arith.mulf %41, %44 : vector<16x1xf32>
    %46 = vector.broadcast %45 : vector<16x1xf32> to vector<16x16xf32>
    %47 = arith.mulf %38, %46 : vector<16x16xf32>
    %cst_11 = arith.constant dense<0.000000e+00> : vector<16x8xf32>
    %48 = tpu.matmul %47, %31, %cst_11 {dimension_numbers = #tpu.dot_dimension_numbers<[1], [0], [0], [1], [0, 0, 1, 1], [], []>} : vector<16x16xf32>, vector<16x8xf32>, vector<16x8xf32> -> vector<16x8xf32>
    %49 = vector.extract_strided_slice %27 {offsets = [0, 8], sizes = [16, 8], strides = [1, 1]} : vector<16x32xf32> to vector<16x8xf32>
    %50 = vector.extract_strided_slice %28 {offsets = [0, 8], sizes = [16, 8], strides = [1, 1]} : vector<16x64xf32> to vector<16x8xf32>
    %51 = vector.extract_strided_slice %28 {offsets = [0, 40], sizes = [16, 8], strides = [1, 1]} : vector<16x64xf32> to vector<16x8xf32>
    "tpu.trace_start"() <{level = 10 : i32, message = "td,sd->ts"}> : () -> ()
    %cst_12 = arith.constant dense<0.000000e+00> : vector<16x16xf32>
    %52 = tpu.matmul %49, %50, %cst_12 {dimension_numbers = #tpu.dot_dimension_numbers<[1], [1], [0], [0], [0, 0, 1, 0], [], []>} : vector<16x8xf32>, vector<16x8xf32>, vector<16x16xf32> -> vector<16x16xf32>
    "tpu.trace_stop"() : () -> ()
    %53 = arith.addf %52, %4 : vector<16x16xf32>
    %cst_13 = arith.constant dense<0xFF800000> : vector<16xf32>
    %54 = vector.multi_reduction <maximumf>, %53, %cst_13 [1] : vector<16x16xf32> to vector<16xf32>
    %55 = vector.shape_cast %54 : vector<16xf32> to vector<16x1xf32>
    %56 = vector.broadcast %55 : vector<16x1xf32> to vector<16x16xf32>
    %57 = arith.subf %53, %56 : vector<16x16xf32>
    %58 = math.exp %57 : vector<16x16xf32>
    %cst_14 = arith.constant dense<0.000000e+00> : vector<16xf32>
    %59 = vector.multi_reduction <add>, %58, %cst_14 [1] : vector<16x16xf32> to vector<16xf32>
    %60 = vector.shape_cast %59 : vector<16xf32> to vector<16x1xf32>
    %61 = tpu.reciprocal %60 {approx = true} : vector<16x1xf32> -> vector<16x1xf32>
    %62 = arith.mulf %60, %61 : vector<16x1xf32>
    %cst_15 = arith.constant 2.000000e+00 : f32
    %63 = vector.broadcast %cst_15 : f32 to vector<16x1xf32>
    %64 = arith.subf %63, %62 : vector<16x1xf32>
    %65 = arith.mulf %61, %64 : vector<16x1xf32>
    %66 = vector.broadcast %65 : vector<16x1xf32> to vector<16x16xf32>
    %67 = arith.mulf %58, %66 : vector<16x16xf32>
    %cst_16 = arith.constant dense<0.000000e+00> : vector<16x8xf32>
    %68 = tpu.matmul %67, %51, %cst_16 {dimension_numbers = #tpu.dot_dimension_numbers<[1], [0], [0], [1], [0, 0, 1, 1], [], []>} : vector<16x16xf32>, vector<16x8xf32>, vector<16x8xf32> -> vector<16x8xf32>
    %69 = vector.extract_strided_slice %27 {offsets = [0, 16], sizes = [16, 8], strides = [1, 1]} : vector<16x32xf32> to vector<16x8xf32>
    %70 = vector.extract_strided_slice %28 {offsets = [0, 16], sizes = [16, 8], strides = [1, 1]} : vector<16x64xf32> to vector<16x8xf32>
    %71 = vector.extract_strided_slice %28 {offsets = [0, 48], sizes = [16, 8], strides = [1, 1]} : vector<16x64xf32> to vector<16x8xf32>
    "tpu.trace_start"() <{level = 10 : i32, message = "td,sd->ts"}> : () -> ()
    %cst_17 = arith.constant dense<0.000000e+00> : vector<16x16xf32>
    %72 = tpu.matmul %69, %70, %cst_17 {dimension_numbers = #tpu.dot_dimension_numbers<[1], [1], [0], [0], [0, 0, 1, 0], [], []>} : vector<16x8xf32>, vector<16x8xf32>, vector<16x16xf32> -> vector<16x16xf32>
    "tpu.trace_stop"() : () -> ()
    %73 = arith.addf %72, %4 : vector<16x16xf32>
    %cst_18 = arith.constant dense<0xFF800000> : vector<16xf32>
    %74 = vector.multi_reduction <maximumf>, %73, %cst_18 [1] : vector<16x16xf32> to vector<16xf32>
    %75 = vector.shape_cast %74 : vector<16xf32> to vector<16x1xf32>
    %76 = vector.broadcast %75 : vector<16x1xf32> to vector<16x16xf32>
    %77 = arith.subf %73, %76 : vector<16x16xf32>
    %78 = math.exp %77 : vector<16x16xf32>
    %cst_19 = arith.constant dense<0.000000e+00> : vector<16xf32>
    %79 = vector.multi_reduction <add>, %78, %cst_19 [1] : vector<16x16xf32> to vector<16xf32>
    %80 = vector.shape_cast %79 : vector<16xf32> to vector<16x1xf32>
    %81 = tpu.reciprocal %80 {approx = true} : vector<16x1xf32> -> vector<16x1xf32>
    %82 = arith.mulf %80, %81 : vector<16x1xf32>
    %cst_20 = arith.constant 2.000000e+00 : f32
    %83 = vector.broadcast %cst_20 : f32 to vector<16x1xf32>
    %84 = arith.subf %83, %82 : vector<16x1xf32>
    %85 = arith.mulf %81, %84 : vector<16x1xf32>
    %86 = vector.broadcast %85 : vector<16x1xf32> to vector<16x16xf32>
    %87 = arith.mulf %78, %86 : vector<16x16xf32>
    %cst_21 = arith.constant dense<0.000000e+00> : vector<16x8xf32>
    %88 = tpu.matmul %87, %71, %cst_21 {dimension_numbers = #tpu.dot_dimension_numbers<[1], [0], [0], [1], [0, 0, 1, 1], [], []>} : vector<16x16xf32>, vector<16x8xf32>, vector<16x8xf32> -> vector<16x8xf32>
    %89 = vector.extract_strided_slice %27 {offsets = [0, 24], sizes = [16, 8], strides = [1, 1]} : vector<16x32xf32> to vector<16x8xf32>
    %90 = vector.extract_strided_slice %28 {offsets = [0, 24], sizes = [16, 8], strides = [1, 1]} : vector<16x64xf32> to vector<16x8xf32>
    %91 = vector.extract_strided_slice %28 {offsets = [0, 56], sizes = [16, 8], strides = [1, 1]} : vector<16x64xf32> to vector<16x8xf32>
    "tpu.trace_start"() <{level = 10 : i32, message = "td,sd->ts"}> : () -> ()
    %cst_22 = arith.constant dense<0.000000e+00> : vector<16x16xf32>
    %92 = tpu.matmul %89, %90, %cst_22 {dimension_numbers = #tpu.dot_dimension_numbers<[1], [1], [0], [0], [0, 0, 1, 0], [], []>} : vector<16x8xf32>, vector<16x8xf32>, vector<16x16xf32> -> vector<16x16xf32>
    "tpu.trace_stop"() : () -> ()
    %93 = arith.addf %92, %4 : vector<16x16xf32>
    %cst_23 = arith.constant dense<0xFF800000> : vector<16xf32>
    %94 = vector.multi_reduction <maximumf>, %93, %cst_23 [1] : vector<16x16xf32> to vector<16xf32>
    %95 = vector.shape_cast %94 : vector<16xf32> to vector<16x1xf32>
    %96 = vector.broadcast %95 : vector<16x1xf32> to vector<16x16xf32>
    %97 = arith.subf %93, %96 : vector<16x16xf32>
    %98 = math.exp %97 : vector<16x16xf32>
    %cst_24 = arith.constant dense<0.000000e+00> : vector<16xf32>
    %99 = vector.multi_reduction <add>, %98, %cst_24 [1] : vector<16x16xf32> to vector<16xf32>
    %100 = vector.shape_cast %99 : vector<16xf32> to vector<16x1xf32>
    %101 = tpu.reciprocal %100 {approx = true} : vector<16x1xf32> -> vector<16x1xf32>
    %102 = arith.mulf %100, %101 : vector<16x1xf32>
    %cst_25 = arith.constant 2.000000e+00 : f32
    %103 = vector.broadcast %cst_25 : f32 to vector<16x1xf32>
    %104 = arith.subf %103, %102 : vector<16x1xf32>
    %105 = arith.mulf %101, %104 : vector<16x1xf32>
    %106 = vector.broadcast %105 : vector<16x1xf32> to vector<16x16xf32>
    %107 = arith.mulf %98, %106 : vector<16x16xf32>
    %cst_26 = arith.constant dense<0.000000e+00> : vector<16x8xf32>
    %108 = tpu.matmul %107, %91, %cst_26 {dimension_numbers = #tpu.dot_dimension_numbers<[1], [0], [0], [1], [0, 0, 1, 1], [], []>} : vector<16x16xf32>, vector<16x8xf32>, vector<16x8xf32> -> vector<16x8xf32>
    %109 = tpu.concatenate %48, %68, %88, %108 in 1 : vector<16x8xf32>, vector<16x8xf32>, vector<16x8xf32>, vector<16x8xf32> -> vector<16x32xf32>
    %cst_27 = arith.constant dense<0.000000e+00> : vector<16x32xf32>
    %110 = tpu.matmul %109, %10, %cst_27 {dimension_numbers = #tpu.dot_dimension_numbers<[1], [0], [0], [1], [0, 0, 1, 1], [], []>} : vector<16x32xf32>, vector<32x32xf32>, vector<16x32xf32> -> vector<16x32xf32>
    %111 = vector.broadcast %20 : vector<1x32xf32> to vector<16x32xf32>
    %112 = arith.addf %110, %111 : vector<16x32xf32>
    %113 = arith.addf %1, %112 : vector<16x32xf32>
    %cst_28 = arith.constant dense<0.000000e+00> : vector<16xf32>
    %114 = vector.multi_reduction <add>, %113, %cst_28 [1] : vector<16x32xf32> to vector<16xf32>
    %115 = vector.shape_cast %114 : vector<16xf32> to vector<16x1xf32>
    %cst_29 = arith.constant 3.200000e+01 : f32
    %116 = vector.broadcast %cst_29 : f32 to vector<16x1xf32>
    %117 = arith.divf %115, %116 : vector<16x1xf32>
    %118 = vector.broadcast %117 : vector<16x1xf32> to vector<16x32xf32>
    %119 = arith.subf %113, %118 : vector<16x32xf32>
    %120 = arith.mulf %119, %119 : vector<16x32xf32>
    %cst_30 = arith.constant dense<0.000000e+00> : vector<16xf32>
    %121 = vector.multi_reduction <add>, %120, %cst_30 [1] : vector<16x32xf32> to vector<16xf32>
    %122 = vector.shape_cast %121 : vector<16xf32> to vector<16x1xf32>
    %cst_31 = arith.constant 3.200000e+01 : f32
    %123 = vector.broadcast %cst_31 : f32 to vector<16x1xf32>
    %124 = arith.divf %122, %123 : vector<16x1xf32>
    %125 = vector.broadcast %117 : vector<16x1xf32> to vector<16x32xf32>
    %126 = arith.subf %113, %125 : vector<16x32xf32>
    %cst_32 = arith.constant 9.99999974E-6 : f32
    %127 = vector.broadcast %cst_32 : f32 to vector<16x1xf32>
    %128 = arith.addf %124, %127 : vector<16x1xf32>
    %129 = math.rsqrt %128 : vector<16x1xf32>
    %130 = vector.broadcast %129 : vector<16x1xf32> to vector<16x32xf32>
    %131 = arith.mulf %126, %130 : vector<16x32xf32>
    %132 = vector.broadcast %15 : vector<1x32xf32> to vector<16x32xf32>
    %133 = arith.mulf %131, %132 : vector<16x32xf32>
    %134 = vector.broadcast %16 : vector<1x32xf32> to vector<16x32xf32>
    %135 = arith.addf %133, %134 : vector<16x32xf32>
    %cst_33 = arith.constant dense<0.000000e+00> : vector<16x32xf32>
    %136 = tpu.matmul %135, %8, %cst_33 {dimension_numbers = #tpu.dot_dimension_numbers<[1], [0], [0], [1], [0, 0, 1, 1], [], []>} : vector<16x32xf32>, vector<32x32xf32>, vector<16x32xf32> -> vector<16x32xf32>
    %137 = vector.broadcast %18 : vector<1x32xf32> to vector<16x32xf32>
    %138 = arith.addf %136, %137 : vector<16x32xf32>
    %cst_34 = arith.constant dense<0.000000e+00> : vector<32x64xf32>
    %139 = tpu.matmul %2, %9, %cst_34 {dimension_numbers = #tpu.dot_dimension_numbers<[1], [0], [0], [1], [0, 0, 1, 1], [], []>} : vector<32x32xf32>, vector<32x64xf32>, vector<32x64xf32> -> vector<32x64xf32>
    %140 = vector.broadcast %19 : vector<1x64xf32> to vector<32x64xf32>
    %141 = arith.addf %139, %140 : vector<32x64xf32>
    %142 = vector.extract_strided_slice %138 {offsets = [0, 0], sizes = [16, 8], strides = [1, 1]} : vector<16x32xf32> to vector<16x8xf32>
    %143 = vector.extract_strided_slice %141 {offsets = [0, 0], sizes = [32, 8], strides = [1, 1]} : vector<32x64xf32> to vector<32x8xf32>
    %144 = vector.extract_strided_slice %141 {offsets = [0, 32], sizes = [32, 8], strides = [1, 1]} : vector<32x64xf32> to vector<32x8xf32>
    "tpu.trace_start"() <{level = 10 : i32, message = "td,sd->ts"}> : () -> ()
    %cst_35 = arith.constant dense<0.000000e+00> : vector<16x32xf32>
    %145 = tpu.matmul %142, %143, %cst_35 {dimension_numbers = #tpu.dot_dimension_numbers<[1], [1], [0], [0], [0, 0, 1, 0], [], []>} : vector<16x8xf32>, vector<32x8xf32>, vector<16x32xf32> -> vector<16x32xf32>
    "tpu.trace_stop"() : () -> ()
    %146 = arith.addf %145, %5 : vector<16x32xf32>
    %cst_36 = arith.constant dense<0xFF800000> : vector<16xf32>
    %147 = vector.multi_reduction <maximumf>, %146, %cst_36 [1] : vector<16x32xf32> to vector<16xf32>
    %148 = vector.shape_cast %147 : vector<16xf32> to vector<16x1xf32>
    %149 = vector.broadcast %148 : vector<16x1xf32> to vector<16x32xf32>
    %150 = arith.subf %146, %149 : vector<16x32xf32>
    %151 = math.exp %150 : vector<16x32xf32>
    %cst_37 = arith.constant dense<0.000000e+00> : vector<16xf32>
    %152 = vector.multi_reduction <add>, %151, %cst_37 [1] : vector<16x32xf32> to vector<16xf32>
    %153 = vector.shape_cast %152 : vector<16xf32> to vector<16x1xf32>
    %154 = tpu.reciprocal %153 {approx = true} : vector<16x1xf32> -> vector<16x1xf32>
    %155 = arith.mulf %153, %154 : vector<16x1xf32>
    %cst_38 = arith.constant 2.000000e+00 : f32
    %156 = vector.broadcast %cst_38 : f32 to vector<16x1xf32>
    %157 = arith.subf %156, %155 : vector<16x1xf32>
    %158 = arith.mulf %154, %157 : vector<16x1xf32>
    %159 = vector.broadcast %158 : vector<16x1xf32> to vector<16x32xf32>
    %160 = arith.mulf %151, %159 : vector<16x32xf32>
    %cst_39 = arith.constant dense<0.000000e+00> : vector<16x8xf32>
    %161 = tpu.matmul %160, %144, %cst_39 {dimension_numbers = #tpu.dot_dimension_numbers<[1], [0], [0], [1], [0, 0, 1, 1], [], []>} : vector<16x32xf32>, vector<32x8xf32>, vector<16x8xf32> -> vector<16x8xf32>
    %162 = vector.extract_strided_slice %138 {offsets = [0, 8], sizes = [16, 8], strides = [1, 1]} : vector<16x32xf32> to vector<16x8xf32>
    %163 = vector.extract_strided_slice %141 {offsets = [0, 8], sizes = [32, 8], strides = [1, 1]} : vector<32x64xf32> to vector<32x8xf32>
    %164 = vector.extract_strided_slice %141 {offsets = [0, 40], sizes = [32, 8], strides = [1, 1]} : vector<32x64xf32> to vector<32x8xf32>
    "tpu.trace_start"() <{level = 10 : i32, message = "td,sd->ts"}> : () -> ()
    %cst_40 = arith.constant dense<0.000000e+00> : vector<16x32xf32>
    %165 = tpu.matmul %162, %163, %cst_40 {dimension_numbers = #tpu.dot_dimension_numbers<[1], [1], [0], [0], [0, 0, 1, 0], [], []>} : vector<16x8xf32>, vector<32x8xf32>, vector<16x32xf32> -> vector<16x32xf32>
    "tpu.trace_stop"() : () -> ()
    %166 = arith.addf %165, %5 : vector<16x32xf32>
    %cst_41 = arith.constant dense<0xFF800000> : vector<16xf32>
    %167 = vector.multi_reduction <maximumf>, %166, %cst_41 [1] : vector<16x32xf32> to vector<16xf32>
    %168 = vector.shape_cast %167 : vector<16xf32> to vector<16x1xf32>
    %169 = vector.broadcast %168 : vector<16x1xf32> to vector<16x32xf32>
    %170 = arith.subf %166, %169 : vector<16x32xf32>
    %171 = math.exp %170 : vector<16x32xf32>
    %cst_42 = arith.constant dense<0.000000e+00> : vector<16xf32>
    %172 = vector.multi_reduction <add>, %171, %cst_42 [1] : vector<16x32xf32> to vector<16xf32>
    %173 = vector.shape_cast %172 : vector<16xf32> to vector<16x1xf32>
    %174 = tpu.reciprocal %173 {approx = true} : vector<16x1xf32> -> vector<16x1xf32>
    %175 = arith.mulf %173, %174 : vector<16x1xf32>
    %cst_43 = arith.constant 2.000000e+00 : f32
    %176 = vector.broadcast %cst_43 : f32 to vector<16x1xf32>
    %177 = arith.subf %176, %175 : vector<16x1xf32>
    %178 = arith.mulf %174, %177 : vector<16x1xf32>
    %179 = vector.broadcast %178 : vector<16x1xf32> to vector<16x32xf32>
    %180 = arith.mulf %171, %179 : vector<16x32xf32>
    %cst_44 = arith.constant dense<0.000000e+00> : vector<16x8xf32>
    %181 = tpu.matmul %180, %164, %cst_44 {dimension_numbers = #tpu.dot_dimension_numbers<[1], [0], [0], [1], [0, 0, 1, 1], [], []>} : vector<16x32xf32>, vector<32x8xf32>, vector<16x8xf32> -> vector<16x8xf32>
    %182 = vector.extract_strided_slice %138 {offsets = [0, 16], sizes = [16, 8], strides = [1, 1]} : vector<16x32xf32> to vector<16x8xf32>
    %183 = vector.extract_strided_slice %141 {offsets = [0, 16], sizes = [32, 8], strides = [1, 1]} : vector<32x64xf32> to vector<32x8xf32>
    %184 = vector.extract_strided_slice %141 {offsets = [0, 48], sizes = [32, 8], strides = [1, 1]} : vector<32x64xf32> to vector<32x8xf32>
    "tpu.trace_start"() <{level = 10 : i32, message = "td,sd->ts"}> : () -> ()
    %cst_45 = arith.constant dense<0.000000e+00> : vector<16x32xf32>
    %185 = tpu.matmul %182, %183, %cst_45 {dimension_numbers = #tpu.dot_dimension_numbers<[1], [1], [0], [0], [0, 0, 1, 0], [], []>} : vector<16x8xf32>, vector<32x8xf32>, vector<16x32xf32> -> vector<16x32xf32>
    "tpu.trace_stop"() : () -> ()
    %186 = arith.addf %185, %5 : vector<16x32xf32>
    %cst_46 = arith.constant dense<0xFF800000> : vector<16xf32>
    %187 = vector.multi_reduction <maximumf>, %186, %cst_46 [1] : vector<16x32xf32> to vector<16xf32>
    %188 = vector.shape_cast %187 : vector<16xf32> to vector<16x1xf32>
    %189 = vector.broadcast %188 : vector<16x1xf32> to vector<16x32xf32>
    %190 = arith.subf %186, %189 : vector<16x32xf32>
    %191 = math.exp %190 : vector<16x32xf32>
    %cst_47 = arith.constant dense<0.000000e+00> : vector<16xf32>
    %192 = vector.multi_reduction <add>, %191, %cst_47 [1] : vector<16x32xf32> to vector<16xf32>
    %193 = vector.shape_cast %192 : vector<16xf32> to vector<16x1xf32>
    %194 = tpu.reciprocal %193 {approx = true} : vector<16x1xf32> -> vector<16x1xf32>
    %195 = arith.mulf %193, %194 : vector<16x1xf32>
    %cst_48 = arith.constant 2.000000e+00 : f32
    %196 = vector.broadcast %cst_48 : f32 to vector<16x1xf32>
    %197 = arith.subf %196, %195 : vector<16x1xf32>
    %198 = arith.mulf %194, %197 : vector<16x1xf32>
    %199 = vector.broadcast %198 : vector<16x1xf32> to vector<16x32xf32>
    %200 = arith.mulf %191, %199 : vector<16x32xf32>
    %cst_49 = arith.constant dense<0.000000e+00> : vector<16x8xf32>
    %201 = tpu.matmul %200, %184, %cst_49 {dimension_numbers = #tpu.dot_dimension_numbers<[1], [0], [0], [1], [0, 0, 1, 1], [], []>} : vector<16x32xf32>, vector<32x8xf32>, vector<16x8xf32> -> vector<16x8xf32>
    %202 = vector.extract_strided_slice %138 {offsets = [0, 24], sizes = [16, 8], strides = [1, 1]} : vector<16x32xf32> to vector<16x8xf32>
    %203 = vector.extract_strided_slice %141 {offsets = [0, 24], sizes = [32, 8], strides = [1, 1]} : vector<32x64xf32> to vector<32x8xf32>
    %204 = vector.extract_strided_slice %141 {offsets = [0, 56], sizes = [32, 8], strides = [1, 1]} : vector<32x64xf32> to vector<32x8xf32>
    "tpu.trace_start"() <{level = 10 : i32, message = "td,sd->ts"}> : () -> ()
    %cst_50 = arith.constant dense<0.000000e+00> : vector<16x32xf32>
    %205 = tpu.matmul %202, %203, %cst_50 {dimension_numbers = #tpu.dot_dimension_numbers<[1], [1], [0], [0], [0, 0, 1, 0], [], []>} : vector<16x8xf32>, vector<32x8xf32>, vector<16x32xf32> -> vector<16x32xf32>
    "tpu.trace_stop"() : () -> ()
    %206 = arith.addf %205, %5 : vector<16x32xf32>
    %cst_51 = arith.constant dense<0xFF800000> : vector<16xf32>
    %207 = vector.multi_reduction <maximumf>, %206, %cst_51 [1] : vector<16x32xf32> to vector<16xf32>
    %208 = vector.shape_cast %207 : vector<16xf32> to vector<16x1xf32>
    %209 = vector.broadcast %208 : vector<16x1xf32> to vector<16x32xf32>
    %210 = arith.subf %206, %209 : vector<16x32xf32>
    %211 = math.exp %210 : vector<16x32xf32>
    %cst_52 = arith.constant dense<0.000000e+00> : vector<16xf32>
    %212 = vector.multi_reduction <add>, %211, %cst_52 [1] : vector<16x32xf32> to vector<16xf32>
    %213 = vector.shape_cast %212 : vector<16xf32> to vector<16x1xf32>
    %214 = tpu.reciprocal %213 {approx = true} : vector<16x1xf32> -> vector<16x1xf32>
    %215 = arith.mulf %213, %214 : vector<16x1xf32>
    %cst_53 = arith.constant 2.000000e+00 : f32
    %216 = vector.broadcast %cst_53 : f32 to vector<16x1xf32>
    %217 = arith.subf %216, %215 : vector<16x1xf32>
    %218 = arith.mulf %214, %217 : vector<16x1xf32>
    %219 = vector.broadcast %218 : vector<16x1xf32> to vector<16x32xf32>
    %220 = arith.mulf %211, %219 : vector<16x32xf32>
    %cst_54 = arith.constant dense<0.000000e+00> : vector<16x8xf32>
    %221 = tpu.matmul %220, %204, %cst_54 {dimension_numbers = #tpu.dot_dimension_numbers<[1], [0], [0], [1], [0, 0, 1, 1], [], []>} : vector<16x32xf32>, vector<32x8xf32>, vector<16x8xf32> -> vector<16x8xf32>
    %222 = tpu.concatenate %161, %181, %201, %221 in 1 : vector<16x8xf32>, vector<16x8xf32>, vector<16x8xf32>, vector<16x8xf32> -> vector<16x32xf32>
    %cst_55 = arith.constant dense<0.000000e+00> : vector<16x32xf32>
    %223 = tpu.matmul %222, %11, %cst_55 {dimension_numbers = #tpu.dot_dimension_numbers<[1], [0], [0], [1], [0, 0, 1, 1], [], []>} : vector<16x32xf32>, vector<32x32xf32>, vector<16x32xf32> -> vector<16x32xf32>
    %224 = vector.broadcast %21 : vector<1x32xf32> to vector<16x32xf32>
    %225 = arith.addf %223, %224 : vector<16x32xf32>
    %c0_56 = arith.constant 0 : index
    %c0_57 = arith.constant 0 : index
    %c0_58 = arith.constant 0 : index
    %226 = vector.load %arg5[%c0_56, %c0_57, %c0_58] : memref<4x16x32xf32, #tpu.memory_space<vmem>>, vector<1x16x32xf32>
    %227 = vector.shape_cast %226 : vector<1x16x32xf32> to vector<16x32xf32>
    %228 = vector.shape_cast %160 : vector<16x32xf32> to vector<1x16x32xf32>
    tpu.vector_store %arg5[%c0_56, %c0_57, %c0_58], %228 {strides = array<i32>} : memref<4x16x32xf32, #tpu.memory_space<vmem>>, vector<1x16x32xf32>,
    %c1 = arith.constant 1 : index
    %c0_59 = arith.constant 0 : index
    %c0_60 = arith.constant 0 : index
    %229 = vector.load %arg5[%c1, %c0_59, %c0_60] : memref<4x16x32xf32, #tpu.memory_space<vmem>>, vector<1x16x32xf32>
    %230 = vector.shape_cast %229 : vector<1x16x32xf32> to vector<16x32xf32>
    %231 = vector.shape_cast %180 : vector<16x32xf32> to vector<1x16x32xf32>
    tpu.vector_store %arg5[%c1, %c0_59, %c0_60], %231 {strides = array<i32>} : memref<4x16x32xf32, #tpu.memory_space<vmem>>, vector<1x16x32xf32>,
    %c2 = arith.constant 2 : index
    %c0_61 = arith.constant 0 : index
    %c0_62 = arith.constant 0 : index
    %232 = vector.load %arg5[%c2, %c0_61, %c0_62] : memref<4x16x32xf32, #tpu.memory_space<vmem>>, vector<1x16x32xf32>
    %233 = vector.shape_cast %232 : vector<1x16x32xf32> to vector<16x32xf32>
    %234 = vector.shape_cast %200 : vector<16x32xf32> to vector<1x16x32xf32>
    tpu.vector_store %arg5[%c2, %c0_61, %c0_62], %234 {strides = array<i32>} : memref<4x16x32xf32, #tpu.memory_space<vmem>>, vector<1x16x32xf32>,
    %c3 = arith.constant 3 : index
    %c0_63 = arith.constant 0 : index
    %c0_64 = arith.constant 0 : index
    %235 = vector.load %arg5[%c3, %c0_63, %c0_64] : memref<4x16x32xf32, #tpu.memory_space<vmem>>, vector<1x16x32xf32>
    %236 = vector.shape_cast %235 : vector<1x16x32xf32> to vector<16x32xf32>
    %237 = vector.shape_cast %220 : vector<16x32xf32> to vector<1x16x32xf32>
    tpu.vector_store %arg5[%c3, %c0_63, %c0_64], %237 {strides = array<i32>} : memref<4x16x32xf32, #tpu.memory_space<vmem>>, vector<1x16x32xf32>,
    %238 = arith.addf %135, %225 : vector<16x32xf32>
    %cst_65 = arith.constant dense<0.000000e+00> : vector<16xf32>
    %239 = vector.multi_reduction <add>, %238, %cst_65 [1] : vector<16x32xf32> to vector<16xf32>
    %240 = vector.shape_cast %239 : vector<16xf32> to vector<16x1xf32>
    %cst_66 = arith.constant 3.200000e+01 : f32
    %241 = vector.broadcast %cst_66 : f32 to vector<16x1xf32>
    %242 = arith.divf %240, %241 : vector<16x1xf32>
    %243 = vector.broadcast %242 : vector<16x1xf32> to vector<16x32xf32>
    %244 = arith.subf %238, %243 : vector<16x32xf32>
    %245 = arith.mulf %244, %244 : vector<16x32xf32>
    %cst_67 = arith.constant dense<0.000000e+00> : vector<16xf32>
    %246 = vector.multi_reduction <add>, %245, %cst_67 [1] : vector<16x32xf32> to vector<16xf32>
    %247 = vector.shape_cast %246 : vector<16xf32> to vector<16x1xf32>
    %cst_68 = arith.constant 3.200000e+01 : f32
    %248 = vector.broadcast %cst_68 : f32 to vector<16x1xf32>
    %249 = arith.divf %247, %248 : vector<16x1xf32>
    %250 = vector.broadcast %242 : vector<16x1xf32> to vector<16x32xf32>
    %251 = arith.subf %238, %250 : vector<16x32xf32>
    %cst_69 = arith.constant 9.99999974E-6 : f32
    %252 = vector.broadcast %cst_69 : f32 to vector<16x1xf32>
    %253 = arith.addf %249, %252 : vector<16x1xf32>
    %254 = math.rsqrt %253 : vector<16x1xf32>
    %255 = vector.broadcast %254 : vector<16x1xf32> to vector<16x32xf32>
    %256 = arith.mulf %251, %255 : vector<16x32xf32>
    %257 = vector.broadcast %15 : vector<1x32xf32> to vector<16x32xf32>
    %258 = arith.mulf %256, %257 : vector<16x32xf32>
    %259 = vector.broadcast %16 : vector<1x32xf32> to vector<16x32xf32>
    %260 = arith.addf %258, %259 : vector<16x32xf32>
    %cst_70 = arith.constant dense<0.000000e+00> : vector<16x64xf32>
    %261 = tpu.matmul %260, %12, %cst_70 {dimension_numbers = #tpu.dot_dimension_numbers<[1], [0], [0], [1], [0, 0, 1, 1], [], []>} : vector<16x32xf32>, vector<32x64xf32>, vector<16x64xf32> -> vector<16x64xf32>
    %262 = vector.broadcast %22 : vector<1x64xf32> to vector<16x64xf32>
    %263 = arith.addf %261, %262 : vector<16x64xf32>
    %cst_71 = arith.constant 0.000000e+00 : f32
    %264 = vector.broadcast %cst_71 : f32 to vector<16x64xf32>
    %265 = arith.maximumf %263, %264 : vector<16x64xf32>
    %cst_72 = arith.constant dense<0.000000e+00> : vector<16x32xf32>
    %266 = tpu.matmul %265, %13, %cst_72 {dimension_numbers = #tpu.dot_dimension_numbers<[1], [0], [0], [1], [0, 0, 1, 1], [], []>} : vector<16x64xf32>, vector<64x32xf32>, vector<16x32xf32> -> vector<16x32xf32>
    %267 = vector.broadcast %23 : vector<1x32xf32> to vector<16x32xf32>
    %268 = arith.addf %266, %267 : vector<16x32xf32>
    %269 = arith.addf %260, %268 : vector<16x32xf32>
    %cst_73 = arith.constant dense<0.000000e+00> : vector<16xf32>
    %270 = vector.multi_reduction <add>, %269, %cst_73 [1] : vector<16x32xf32> to vector<16xf32>
    %271 = vector.shape_cast %270 : vector<16xf32> to vector<16x1xf32>
    %cst_74 = arith.constant 3.200000e+01 : f32
    %272 = vector.broadcast %cst_74 : f32 to vector<16x1xf32>
    %273 = arith.divf %271, %272 : vector<16x1xf32>
    %274 = vector.broadcast %273 : vector<16x1xf32> to vector<16x32xf32>
    %275 = arith.subf %269, %274 : vector<16x32xf32>
    %276 = arith.mulf %275, %275 : vector<16x32xf32>
    %cst_75 = arith.constant dense<0.000000e+00> : vector<16xf32>
    %277 = vector.multi_reduction <add>, %276, %cst_75 [1] : vector<16x32xf32> to vector<16xf32>
    %278 = vector.shape_cast %277 : vector<16xf32> to vector<16x1xf32>
    %cst_76 = arith.constant 3.200000e+01 : f32
    %279 = vector.broadcast %cst_76 : f32 to vector<16x1xf32>
    %280 = arith.divf %278, %279 : vector<16x1xf32>
    %281 = vector.broadcast %273 : vector<16x1xf32> to vector<16x32xf32>
    %282 = arith.subf %269, %281 : vector<16x32xf32>
    %cst_77 = arith.constant 9.99999974E-6 : f32
    %283 = vector.broadcast %cst_77 : f32 to vector<16x1xf32>
    %284 = arith.addf %280, %283 : vector<16x1xf32>
    %285 = math.rsqrt %284 : vector<16x1xf32>
    %286 = vector.broadcast %285 : vector<16x1xf32> to vector<16x32xf32>
    %287 = arith.mulf %282, %286 : vector<16x32xf32>
    %288 = vector.broadcast %15 : vector<1x32xf32> to vector<16x32xf32>
    %289 = arith.mulf %287, %288 : vector<16x32xf32>
    %290 = vector.broadcast %16 : vector<1x32xf32> to vector<16x32xf32>
    %291 = arith.addf %289, %290 : vector<16x32xf32>
    %c0_78 = arith.constant 0 : index
    %c0_79 = arith.constant 0 : index
    %292 = vector.load %arg4[%c0_78, %c0_79] : memref<16x32xf32, #tpu.memory_space<vmem>>, vector<16x32xf32>
    tpu.vector_store %arg4[%c0_78, %c0_79], %291 {strides = array<i32>} : memref<16x32xf32, #tpu.memory_space<vmem>>, vector<16x32xf32>,
    return
  }
}

</mosaic_0001>

<bundles_post_ra>
// kernel: decoder_layer.1
= control target key start
LH: loop header
LB: loop body
LE: loop exit
PB: predicated region body
PF: predicated region fallthrough
CT: control target
= control target key end

     0   :  { %vm66_vm0 = vcmask 261120   ;;  %s3749_s0 = inlined_call_operand.vmem [shape: f32[48,32], index: 0, kind: input, shape index: {}]   ;;  %s3750_s1 = inlined_call_operand.vmem [shape: f32[16,48], index: 1, kind: input, shape index: {}]   ;;  %s3751_s2 = inlined_call_operand.vmem [shape: f32[256,96], index: 2, kind: input, shape index: {}]   ;;  %s3752_s3 = inlined_call_operand.vmem [shape: f32[9,96], index: 3, kind: input, shape index: {}]   ;;  %s3753_s4 = inlined_call_operand.hbm [shape: f32[16,32], index: 4, kind: output, shape index: {0}]   ;;  %s3754_s5 = inlined_call_operand.vmem [shape: f32[4,16,32], index: 5, kind: output, shape index: {1}]  }
   0x1   :  { %v31_v0 = vld [vmem:[%s3751_s2 + $0x18] sm:$0xff]  ;;  %v30_v1 = vld [vmem:[%s3751_s2 + $0x10] sm:$0xff]  ;;  %v3191_v2 = vld [vmem:[%s3749_s0] sm:$0xff] }
   0x2   :  { %2789 = vmatprep.subr.mxu0 %v31_v0  ;;  %v29_v3 = vld [vmem:[%s3751_s2 + $0x8] sm:$0xff]  ;;  %2797 = vmatprep.mubr.msk.f32.mxu0 %vm66_vm0, %v3191_v2 }
   0x3   :  { %2790 = vmatpush3.msra.mxu0 %v31_v0 }
   0x4   :  { %11 = vsyncpa [#allocation3], 0  ;;  %2791 = vmatprep.subr.mxu0 %v30_v1  ;;  %v28_v4 = vld [vmem:[%s3751_s2] sm:$0xff]  ;;  %v3204_v5 = vld [vmem:[%s3749_s0 + $0x8] sm:$0xff]  ;;  %v62_v6 = vlaneseq  ;;  %vm154_vm1 = vcmask 64512   ;;  %s3136_s7 = smov 88  }
   0x5   :  { %2792 = vmatpush3.msra.mxu0 %v30_v1  ;;  %v3214_v9 = vld [vmem:[%s3752_s3] sm:$0xff]  ;;  %s3137_s8 = smov 96   ;;  %s3138_s9 = smov 120   ;;  %v3250_v21 = vld [vmem:[%s3750_s1 + $0x8] sm:$0xff]  ;;  %vm238_vm2 = vcmask 130048   ;;  %vm1000_vm3 = vcmask 195584  }
   0x6   :  { %2793 = vmatprep.subr.mxu0 %v29_v3  ;;  %v3208_v7 = vshrl.u32 %v62_v6, 7  ;;  %v3255_v23 = vld [vmem:[%s3750_s1] sm:$0xff]  ;;  %s3139_s1 = smov 64   ;;  %s3140_s14 = smov 56   ;;  %vm2446_vm4 = vcmask 523264  }
   0x7   :  { %2794 = vmatpush3.msra.mxu0 %v29_v3  ;;  %s3141_s15 = smov 80   ;;  %s3142_s16 = smov 72  }
   0x8   :  { %2795 = vmatprep.subr.mxu0 %v28_v4  ;;  %v64_v8 = vsub.s32 2, %v3208_v7  ;;  %s3143_s17 = smov 112   ;;  %s3144_s18 = smov 104  }
   0x9   :  { %2796 = vmatpush3.msra.mxu0 %v28_v4  ;;  %s3145_s19 = smov 48   ;;  %s3146_s20 = smov 8  }
   0xa   :  { %2798 = vmatmul.mubr.msk.f32.vlgmr.msra.gmra.mxu0 %vm66_vm0, %v3204_v5  ;;  %v65_v10 = vrot.slane %v3214_v9, %v64_v8  ;;  %s3147_s21 = smov 40   ;;  %s3148_s30 = smov 16  }
   0xb   :  { %s3149_s6 = smov 24  }
  0xca   :  { %v2799_v11 = vpop.f32.mrf.mxu0 }
  0xcb   :  { %v3217_v12 = vadd.f32 %v2799_v11, %v65_v10 }
  0xcc   :  { %v139_v13 = vpop.f32.mrf.mxu0 }
  0xcd   :  { %v3219_v14 = vadd.f32 %v139_v13, %v65_v10  ;;  %360 = vrot.lane.b32.xlu1 %v3217_v12, %s3136_s7  ;;  %152 = vrot.lane.b32.xlu0 %v3217_v12, %s3137_s8 }
  0xcf   :  { %2804 = vmatprep.mubr.msk.f32.mxu1 %vm154_vm1, %v3219_v14 }
  0xd1   :  { %358 = vrot.lane.b32.xlu1 %v3219_v14, %s3136_s7  ;;  %150 = vrot.lane.b32.xlu0 %v3219_v14, %s3137_s8 }
  0xd5   :  { %356 = vrot.lane.b32.xlu1 %v3217_v12, %s3138_s9  ;;  %354 = vrot.lane.b32.xlu0 %v3219_v14, %s3138_s9 }
 0x13f   :  { %v153_v15 = vpop.permute.xlu0 %152  ;;  %v361_v16 = vpop.permute.xlu1 %360 }
 0x140   :  { %2800 = vmatprep.subr.msk.mxu1 %vm154_vm1, %v153_v15 }
 0x141   :  { %2801 = vmatpush3.xpose.msk.msra.mxu1 %vm154_vm1, %v153_v15 }
 0x143   :  { %v151_v17 = vpop.permute.xlu0 %150  ;;  %v359_v19 = vpop.permute.xlu1 %358 }
 0x144   :  { %2802 = vmatprep.subr.msk.mxu1 %vm154_vm1, %v151_v17 }
 0x145   :  { %2803 = vmatpush3.xpose.msk.msra.mxu1 %vm154_vm1, %v151_v17 }
 0x146   :  { %2814 = vmatprep.subr.msk.mxu1 %vm154_vm1, %v361_v16 }
 0x147   :  { %v355_v18 = vpop.permute.xlu0 %354  ;;  %v357_v20 = vpop.permute.xlu1 %356 }
 0x148   :  { %2805 = vmatmul.mubr.msk.f32.vlgmr.msra.gmra.mxu1 %vm154_vm1, %v3217_v12 }
 0x149   :  { %2815 = vmatpush3.xpose.msk.msra.mxu1 %vm154_vm1, %v361_v16  ;;  %2818 = vmatprep.mubr.msk.f32.mxu1 %vm154_vm1, %v355_v18 }
 0x14a   :  { %2816 = vmatprep.subr.msk.mxu1 %vm154_vm1, %v359_v19 }
 0x14d   :  { %2817 = vmatpush3.xpose.msk.msra.mxu1 %vm154_vm1, %v359_v19 }
 0x150   :  { %2819 = vmatmul.mubr.msk.f32.vlgmr.msra.gmra.mxu1 %vm154_vm1, %v357_v20 }
 0x208   :  { %v2806_v22 = vpop.f32.mrf.mxu1 }
 0x209   :  { %v235_v24 = vadd.f32 %v2806_v22, %v3250_v21 }
 0x20a   :  { %v229_v25 = vpop.f32.mrf.mxu1 }
 0x20b   :  { %v230_v26 = vadd.f32 %v229_v25, %v3255_v23  ;;  %v242_v27 = vsel %vm238_vm2, %v235_v24, -inf }
 0x20c   :  { %243 = vmax.xlane.f32.xlu1 %v242_v27 }
 0x20d   :  { %v239_v28 = vsel %vm238_vm2, %v230_v26, -inf }
 0x20e   :  { %240 = vmax.xlane.f32.xlu0 %v239_v28 }
 0x210   :  { %v2820_v29 = vpop.f32.mrf.mxu1 }
 0x211   :  { %v442_v32 = vadd.f32 %v2820_v29, %v3250_v21 }
 0x212   :  { %v436_v30 = vpop.f32.mrf.mxu1 }
 0x213   :  { %v437_v31 = vadd.f32 %v436_v30, %v3255_v23  ;;  %v448_v34 = vsel %vm238_vm2, %v442_v32, -inf }
 0x215   :  { %v445_v33 = vsel %vm238_vm2, %v437_v31, -inf }
 0x216   :  { %446 = vmax.xlane.f32.xlu0 %v445_v33 }
 0x21a   :  { %449 = vmax.xlane.f32.xlu0 %v448_v34 }
 0x21d   :  { %269 = vrot.lane.b32.xlu1 %v3217_v12, %s3139_s1 }
 0x295   :  { %v244_v35 = vpop.xlane.xlu1 %243 }
 0x296   :  { %v246_v36 = vsub.f32 %v235_v24, %v244_v35 }
 0x297   :  { %v241_v37 = vpop.xlane.xlu0 %240 }
 0x298   :  { %v249_v38 = vmul.f32 1.442695, %v246_v36  ;;  %v245_v39 = vsub.f32 %v230_v26, %v241_v37 }
 0x299   :  { %v270_v40 = vpop.permute.xlu1 %269 }
 0x29a   :  { %3037 = vpow2.f32 %v249_v38  ;;  %v247_v41 = vmul.f32 1.442695, %v245_v39  ;;  %2807 = vmatprep.subr.mxu0 %v270_v40 }
 0x29b   :  { %2808 = vmatpush3.msra.mxu0 %v270_v40 }
 0x29c   :  { %3039 = vpow2.f32 %v247_v41 }
 0x29f   :  { %v447_v42 = vpop.xlane.xlu0 %446 }
 0x2a0   :  { %v451_v52 = vsub.f32 %v437_v31, %v447_v42 }
 0x2a2   :  { %v453_v53 = vmul.f32 1.442695, %v451_v52 }
 0x2a3   :  { %v450_v43 = vpop.xlane.xlu0 %449 }
 0x2a4   :  { %v452_v44 = vsub.f32 %v442_v32, %v450_v43 }
 0x2a6   :  { %v455_v45 = vmul.f32 1.442695, %v452_v44 }
 0x2a7   :  { %v3038_v46 = vpop.eup %3037 }
 0x2a8   :  { %3041 = vpow2.f32 %v455_v45  ;;  %v254_v47 = vsel %vm238_vm2, %v3038_v46, 0.0 }
 0x2a9   :  { %v3040_v48 = vpop.eup %3039  ;;  %255 = vadd.xlane.f32.xlu0 %v254_v47  ;;  %3043 = vpow2.f32 %v453_v53 }
 0x2aa   :  { %v251_v49 = vsel %vm238_vm2, %v3040_v48, 0.0 }
 0x2ab   :  { %252 = vadd.xlane.f32.xlu1 %v251_v49 }
 0x2b5   :  { %v3269_v50 = vpop.eup %3041 }
 0x2b6   :  { %v460_v51 = vsel %vm238_vm2, %v3269_v50, 0.0  ;;  %v3044_v54 = vpop.eup %3043 }
 0x2b7   :  { %461 = vadd.xlane.f32.xlu0 %v460_v51  ;;  %v457_v55 = vsel %vm238_vm2, %v3044_v54, 0.0 }
 0x2bc   :  { %475 = vrot.lane.b32.xlu1 %v3217_v12, %s3140_s14 }
 0x2c0   :  { %473 = vrot.lane.b32.xlu1 %v3219_v14, %s3140_s14 }
 0x2cd   :  { %267 = vrot.lane.b32.xlu0 %v3219_v14, %s3139_s1 }
 0x2d1   :  { %566 = vrot.lane.b32.xlu0 %v3217_v12, %s3141_s15 }
 0x2d5   :  { %772 = vrot.lane.b32.xlu0 %v3217_v12, %s3142_s16 }
 0x2d9   :  { %562 = vrot.lane.b32.xlu0 %v3217_v12, %s3143_s17 }
 0x2dd   :  { %766 = vrot.lane.b32.xlu0 %v3219_v14, %s3144_s18 }
 0x2e4   :  { %458 = vadd.xlane.f32.xlu1 %v457_v55 }
 0x2f5   :  { %564 = vrot.lane.b32.xlu1 %v3219_v14, %s3141_s15 }
 0x2f9   :  { %560 = vrot.lane.b32.xlu1 %v3219_v14, %s3143_s17 }
 0x2fd   :  { %770 = vrot.lane.b32.xlu1 %v3219_v14, %s3142_s16 }
 0x301   :  { %768 = vrot.lane.b32.xlu1 %v3217_v12, %s3144_s18 }
 0x332   :  { %v256_v56 = vpop.xlane.xlu0 %255 }
 0x333   :  { %3045 = vrcp.f32 %v256_v56 }
 0x334   :  { %v253_v57 = vpop.xlane.xlu1 %252 }
 0x335   :  { %3047 = vrcp.f32 %v253_v57 }
 0x338   :  { %v476_v4 = vpop.permute.xlu1 %475 }
 0x33c   :  { %v474_v15 = vpop.permute.xlu1 %473 }
 0x340   :  { %v3046_v58 = vpop.eup %3045  ;;  %v462_v59 = vpop.xlane.xlu0 %461 }
 0x341   :  { %v260_v60 = vmul.f32 %v3046_v58, %v256_v56  ;;  %3049 = vrcp.f32 %v462_v59 }
 0x342   :  { %v3048_v61 = vpop.eup %3047 }
 0x343   :  { %v262_v62 = vsub.f32 2.0, %v260_v60  ;;  %v259_v63 = vmul.f32 %v3048_v61, %v253_v57 }
 0x344   :  { %v268_v0 = vpop.permute.xlu0 %267 }
 0x345   :  { %v261_v1 = vsub.f32 2.0, %v259_v63  ;;  %2809 = vmatprep.subr.mxu0 %v268_v0  ;;  %v264_v3 = vmul.f32 %v3046_v58, %v262_v62 }
 0x346   :  { %2810 = vmatpush3.msra.mxu0 %v268_v0 }
 0x347   :  { %v263_v6 = vmul.f32 %v3048_v61, %v261_v1  ;;  %2821 = vmatprep.subr.mxu0 %v476_v4  ;;  %v266_v11 = vmul.f32 %v3038_v46, %v264_v3 }
 0x348   :  { %v567_v8 = vpop.permute.xlu0 %566 }
 0x349   :  { %v265_v10 = vmul.f32 %v3040_v48, %v263_v6 }
 0x34b   :  { %2811 = vmatprep.mubr.msk.f32.mxu0 %vm238_vm2, %v265_v10 }
 0x34c   :  { %2812 = vmatmul.mubr.msk.f32.vlgmr.msra.gmra.mxu0 %vm238_vm2, %v266_v11  ;;  %v773_v13 = vpop.permute.xlu0 %772 }
 0x34d   :  { %2822 = vmatpush3.msra.mxu0 %v476_v4  ;;  %2842 = vmatprep.subr.msk.mxu1 %vm154_vm1, %v773_v13 }
 0x34e   :  { %2823 = vmatprep.subr.mxu0 %v474_v15  ;;  %2843 = vmatpush3.xpose.msk.msra.mxu1 %vm154_vm1, %v773_v13  ;;  %v3050_v20 = vpop.eup %3049 }
 0x34f   :  { %2824 = vmatpush3.msra.mxu0 %v474_v15  ;;  %v466_v24 = vmul.f32 %v3050_v20, %v462_v59 }
 0x350   :  { %2828 = vmatprep.subr.msk.mxu0 %vm154_vm1, %v567_v8  ;;  %v563_v16 = vpop.permute.xlu0 %562 }
 0x351   :  { %v468_v27 = vsub.f32 2.0, %v466_v24 }
 0x353   :  { %v470_v31 = vmul.f32 %v3050_v20, %v468_v27 }
 0x354   :  { %v767_v17 = vpop.permute.xlu0 %766 }
 0x355   :  { %2846 = vmatprep.mubr.msk.f32.mxu1 %vm154_vm1, %v767_v17  ;;  %v472_v34 = vmul.f32 %v3269_v50, %v470_v31 }
 0x36d   :  { %v459_v18 = vpop.xlane.xlu1 %458 }
 0x36e   :  { %3051 = vrcp.f32 %v459_v18 }
 0x371   :  { %v565_v19 = vpop.permute.xlu1 %564 }
 0x375   :  { %v561_v22 = vpop.permute.xlu1 %560 }
 0x379   :  { %v771_v25 = vpop.permute.xlu1 %770 }
 0x37a   :  { %2844 = vmatprep.subr.msk.mxu1 %vm154_vm1, %v771_v25 }
 0x37b   :  { %v3052_v26 = vpop.eup %3051  ;;  %2845 = vmatpush3.xpose.msk.msra.mxu1 %vm154_vm1, %v771_v25 }
 0x37c   :  { %v465_v28 = vmul.f32 %v3052_v26, %v459_v18 }
 0x37d   :  { %v769_v29 = vpop.permute.xlu1 %768 }
 0x37e   :  { %v467_v30 = vsub.f32 2.0, %v465_v28  ;;  %2847 = vmatmul.mubr.msk.f32.vlgmr.msra.gmra.mxu1 %vm154_vm1, %v769_v29 }
 0x380   :  { %v469_v32 = vmul.f32 %v3052_v26, %v467_v30 }
 0x382   :  { %v471_v33 = vmul.f32 %v3044_v54, %v469_v32 }
 0x384   :  { %2825 = vmatprep.mubr.msk.f32.mxu0 %vm238_vm2, %v471_v33 }
 0x385   :  { %2826 = vmatmul.mubr.msk.f32.vlgmr.msra.gmra.mxu0 %vm238_vm2, %v472_v34 }
 0x386   :  { %2829 = vmatpush3.xpose.msk.msra.mxu0 %vm154_vm1, %v567_v8  ;;  %2832 = vmatprep.mubr.msk.f32.mxu0 %vm154_vm1, %v561_v22 }
 0x387   :  { %2830 = vmatprep.subr.msk.mxu0 %vm154_vm1, %v565_v19 }
 0x38a   :  { %2831 = vmatpush3.xpose.msk.msra.mxu0 %vm154_vm1, %v565_v19 }
 0x38d   :  { %2833 = vmatmul.mubr.msk.f32.vlgmr.msra.gmra.mxu0 %vm154_vm1, %v563_v16 }
 0x40c   :  { %v3311_v35 = vpop.f32.mrf.mxu0 }
 0x40e   :  { %v3313_v36 = vpop.f32.mrf.mxu0 }
 0x43e   :  { %v2848_v38 = vpop.f32.mrf.mxu1 }
 0x43f   :  { %v854_v48 = vadd.f32 %v2848_v38, %v3250_v21 }
 0x440   :  { %v848_v42 = vpop.f32.mrf.mxu1 }
 0x441   :  { %v849_v46 = vadd.f32 %v848_v42, %v3255_v23  ;;  %v860_v50 = vsel %vm238_vm2, %v854_v48, -inf }
 0x443   :  { %v857_v49 = vsel %vm238_vm2, %v849_v46, -inf }
 0x445   :  { %v2827_v37 = vpop.f32.mrf.mxu0 }
 0x447   :  { %v551_v39 = vpop.f32.mrf.mxu0 }
 0x44d   :  { %v2834_v40 = vpop.f32.mrf.mxu0 }
 0x44e   :  { %v648_v41 = vadd.f32 %v2834_v40, %v3250_v21 }
 0x44f   :  { %v642_v43 = vpop.f32.mrf.mxu0 }
 0x450   :  { %v643_v44 = vadd.f32 %v642_v43, %v3255_v23  ;;  %v654_v45 = vsel %vm238_vm2, %v648_v41, -inf  ;;  %v43_v43 = vld [vmem:[%s3751_s2 + $0x78] sm:$0xff] }
 0x451   :  { %655 = vmax.xlane.f32.xlu1 %v654_v45  ;;  %v41_v45 = vld [vmem:[%s3751_s2 + $0x68] sm:$0xff] }
 0x452   :  { %v651_v47 = vsel %vm238_vm2, %v643_v44, -inf }
 0x453   :  { %652 = vmax.xlane.f32.xlu0 %v651_v47 }
 0x457   :  { %858 = vmax.xlane.f32.xlu0 %v857_v49 }
 0x45b   :  { %861 = vmax.xlane.f32.xlu0 %v860_v50 }
 0x4da   :  { %v656_v51 = vpop.xlane.xlu1 %655 }
 0x4db   :  { %v658_v52 = vsub.f32 %v648_v41, %v656_v51 }
 0x4dc   :  { %v653_v53 = vpop.xlane.xlu0 %652 }
 0x4dd   :  { %v661_v54 = vmul.f32 1.442695, %v658_v52  ;;  %v657_v4 = vsub.f32 %v643_v44, %v653_v53  ;;  %v42_v44 = vld [vmem:[%s3751_s2 + $0x70] sm:$0xff] }
 0x4df   :  { %3053 = vpow2.f32 %v661_v54  ;;  %v659_v6 = vmul.f32 1.442695, %v657_v4 }
 0x4e0   :  { %v859_v55 = vpop.xlane.xlu0 %858 }
 0x4e1   :  { %v863_v56 = vsub.f32 %v849_v46, %v859_v55  ;;  %v40_v46 = vld [vmem:[%s3751_s2 + $0x60] sm:$0xff] }
 0x4e3   :  { %v865_v57 = vmul.f32 1.442695, %v863_v56 }
 0x4e4   :  { %v862_v58 = vpop.xlane.xlu0 %861 }
 0x4e5   :  { %3055 = vpow2.f32 %v865_v57  ;;  %v864_v59 = vsub.f32 %v854_v48, %v862_v58 }
 0x4e7   :  { %v867_v60 = vmul.f32 1.442695, %v864_v59 }
 0x4e9   :  { %3057 = vpow2.f32 %v867_v60 }
 0x4ea   :  { %3059 = vpow2.f32 %v659_v6 }
 0x4ec   :  { %v3054_v61 = vpop.eup %3053 }
 0x4ed   :  { %v666_v62 = vsel %vm238_vm2, %v3054_v61, 0.0 }
 0x4ee   :  { %667 = vadd.xlane.f32.xlu0 %v666_v62 }
 0x4f2   :  { %v3056_v63 = vpop.eup %3055 }
 0x4f3   :  { %v869_v0 = vsel %vm238_vm2, %v3056_v63, 0.0 }
 0x4f4   :  { %870 = vadd.xlane.f32.xlu1 %v869_v0 }
 0x4f6   :  { %v3058_v1 = vpop.eup %3057 }
 0x4f7   :  { %v872_v3 = vsel %vm238_vm2, %v3058_v1, 0.0  ;;  %v3060_v8 = vpop.eup %3059 }
 0x4f8   :  { %873 = vadd.xlane.f32.xlu0 %v872_v3  ;;  %v663_v10 = vsel %vm238_vm2, %v3060_v8, 0.0 }
 0x505   :  { %681 = vrot.lane.b32.xlu1 %v3217_v12, %s3145_s19 }
 0x50e   :  { %679 = vrot.lane.b32.xlu0 %v3219_v14, %s3145_s19 }
 0x512   :  { %974 = vrot.lane.b32.xlu0 %v551_v39, %s3146_s20 }
 0x529   :  { %664 = vadd.xlane.f32.xlu1 %v663_v10 }
 0x53a   :  { %887 = vrot.lane.b32.xlu1 %v3217_v12, %s3147_s21 }
 0x53e   :  { %885 = vrot.lane.b32.xlu1 %v3219_v14, %s3147_s21 }
 0x542   :  { %976 = vrot.lane.b32.xlu1 %v2827_v37, %s3146_s20 }
 0x577   :  { %v668_v11 = vpop.xlane.xlu0 %667 }
 0x578   :  { %3061 = vrcp.f32 %v668_v11 }
 0x57d   :  { %v871_v13 = vpop.xlane.xlu1 %870 }
 0x57e   :  { %3063 = vrcp.f32 %v871_v13 }
 0x581   :  { %v682_v15 = vpop.permute.xlu1 %681  ;;  %v874_v16 = vpop.xlane.xlu0 %873 }
 0x582   :  { %2835 = vmatprep.subr.mxu0 %v682_v15  ;;  %3065 = vrcp.f32 %v874_v16 }
 0x583   :  { %2836 = vmatpush3.msra.mxu0 %v682_v15  ;;  %v23_v15 = vld [vmem:[%s3749_s0 + $0x18] sm:$0xff] }
 0x585   :  { %v680_v17 = vpop.permute.xlu0 %679  ;;  %v3062_v12 = vpop.eup %3061 }
 0x586   :  { %2837 = vmatprep.subr.mxu0 %v680_v17  ;;  %v672_v20 = vmul.f32 %v3062_v12, %v668_v11  ;;  %v39_v11 = vld [vmem:[%s3751_s2 + $0x58] sm:$0xff] }
 0x587   :  { %2838 = vmatpush3.msra.mxu0 %v680_v17  ;;  %v25_v17 = vld [vmem:[%s3749_s0 + $0x28] sm:$0xff] }
 0x588   :  { %v674_v26 = vsub.f32 2.0, %v672_v20 }
 0x589   :  { %v975_v52 = vpop.permute.xlu0 %974 }
 0x58a   :  { %v676_v31 = vmul.f32 %v3062_v12, %v674_v26  ;;  %v996_v55 = vsel %vm154_vm1, %v3313_v36, %v975_v52  ;;  %v1005_v36 = vsub.s32 5, %v3208_v7 }
 0x58b   :  { %v3064_v14 = vpop.eup %3063 }
 0x58c   :  { %v877_v24 = vmul.f32 %v3064_v14, %v871_v13  ;;  %v678_v38 = vmul.f32 %v3054_v61, %v676_v31  ;;  %v38_v13 = vld [vmem:[%s3751_s2 + $0x50] sm:$0xff]  ;;  %v1216_v31 = vsub.s32 4, %v3208_v7 }
 0x58e   :  { %v879_v28 = vsub.f32 2.0, %v877_v24 }
 0x58f   :  { %v3066_v22 = vpop.eup %3065 }
 0x590   :  { %v878_v27 = vmul.f32 %v3066_v22, %v874_v16  ;;  %v881_v33 = vmul.f32 %v3064_v14, %v879_v28  ;;  %v24_v16 = vld [vmem:[%s3749_s0 + $0x20] sm:$0xff]  ;;  %v35_v28 = vld [vmem:[%s3751_s2 + $0x38] sm:$0xff] }
 0x591   :  { %2867 = vmatprep.subr.mxu1 %v35_v28 }
 0x592   :  { %v880_v32 = vsub.f32 2.0, %v878_v27  ;;  %v883_v40 = vmul.f32 %v3056_v63, %v881_v33  ;;  %v1006_v63 = vrot.slane %v3214_v9, %v1005_v36  ;;  %2868 = vmatpush3.msra.mxu1 %v35_v28 }
 0x594   :  { %v882_v39 = vmul.f32 %v3066_v22, %v880_v32  ;;  %v1217_v32 = vrot.slane %v3214_v9, %v1216_v31 }
 0x596   :  { %v884_v42 = vmul.f32 %v3058_v1, %v882_v39 }
 0x5b2   :  { %v665_v18 = vpop.xlane.xlu1 %664 }
 0x5b3   :  { %3067 = vrcp.f32 %v665_v18 }
 0x5b6   :  { %v888_v19 = vpop.permute.xlu1 %887 }
 0x5b7   :  { %2849 = vmatprep.subr.mxu0 %v888_v19 }
 0x5ba   :  { %v886_v41 = vpop.permute.xlu1 %885 }
 0x5be   :  { %v977_v51 = vpop.permute.xlu1 %976 }
 0x5bf   :  { %v997_v57 = vsel %vm154_vm1, %v3311_v35, %v977_v51 }
 0x5c0   :  { %v3068_v25 = vpop.eup %3067 }
 0x5c1   :  { %v671_v29 = vmul.f32 %v3068_v25, %v665_v18 }
 0x5c3   :  { %v673_v30 = vsub.f32 2.0, %v671_v29  ;;  %v34_v29 = vld [vmem:[%s3751_s2 + $0x30] sm:$0xff] }
 0x5c4   :  { %2869 = vmatprep.subr.mxu1 %v34_v29 }
 0x5c5   :  { %v675_v34 = vmul.f32 %v3068_v25, %v673_v30  ;;  %v33_v30 = vld [vmem:[%s3751_s2 + $0x28] sm:$0xff]  ;;  %2870 = vmatpush3.msra.mxu1 %v34_v29 }
 0x5c6   :  { %2871 = vmatprep.subr.mxu1 %v33_v30 }
 0x5c7   :  { %v677_v37 = vmul.f32 %v3060_v8, %v675_v34  ;;  %2872 = vmatpush3.msra.mxu1 %v33_v30 }
 0x5c9   :  { %2839 = vmatprep.mubr.msk.f32.mxu0 %vm238_vm2, %v677_v37 }
 0x5ca   :  { %2840 = vmatmul.mubr.msk.f32.vlgmr.msra.gmra.mxu0 %vm238_vm2, %v678_v38 }
 0x5cb   :  { %2850 = vmatpush3.msra.mxu0 %v888_v19  ;;  %2853 = vmatprep.mubr.msk.f32.mxu0 %vm238_vm2, %v883_v40 }
 0x5cc   :  { %2851 = vmatprep.subr.mxu0 %v886_v41 }
 0x5cd   :  { %2852 = vmatpush3.msra.mxu0 %v886_v41 }
 0x5ce   :  { %2854 = vmatmul.mubr.msk.f32.vlgmr.msra.gmra.mxu0 %vm238_vm2, %v884_v42  ;;  %2856 = vmatprep.subr.mxu0 %v43_v43 }
 0x5cf   :  { %2857 = vmatpush3.msra.mxu0 %v43_v43 }
 0x5d0   :  { %2858 = vmatprep.subr.mxu0 %v42_v44 }
 0x5d1   :  { %2859 = vmatpush3.msra.mxu0 %v42_v44 }
 0x5d2   :  { %2860 = vmatprep.subr.mxu0 %v41_v45 }
 0x5d3   :  { %2861 = vmatpush3.msra.mxu0 %v41_v45 }
 0x5d4   :  { %2862 = vmatprep.subr.mxu0 %v40_v46 }
 0x5d5   :  { %2863 = vmatpush3.msra.mxu0 %v40_v46 }
 0x5d6   :  { %2878 = vmatprep.subr.mxu0 %v39_v11 }
 0x68a   :  { %v2841_v47 = vpop.f32.mrf.mxu0 }
 0x68b   :  { %984 = vrot.lane.b32.xlu1 %v2841_v47, %s3148_s30  ;;  %v1119_v47 = vsub.s32 0, %v3208_v7 }
 0x68c   :  { %v757_v48 = vpop.f32.mrf.mxu0 }
 0x68d   :  { %982 = vrot.lane.b32.xlu0 %v757_v48, %s3148_s30  ;;  %v1125_v48 = vsub.s32 1, %v3208_v7 }
 0x68e   :  { %v2855_v49 = vpop.f32.mrf.mxu0 }
 0x68f   :  { %992 = vrot.lane.b32.xlu1 %v2855_v49, %s3149_s6  ;;  %v3428_v49 = vrot.slane %v3214_v9, %v1119_v47  ;;  %v3431_v52 = vrot.slane %v3214_v9, %v1125_v48 }
 0x690   :  { %v963_v50 = vpop.f32.mrf.mxu0 }
 0x691   :  { %990 = vrot.lane.b32.xlu0 %v963_v50, %s3149_s6 }
 0x6fd   :  { %v985_v53 = vpop.permute.xlu1 %984 }
 0x6fe   :  { %v999_v60 = vsel %vm238_vm2, %v997_v57, %v985_v53 }
 0x6ff   :  { %v983_v54 = vpop.permute.xlu0 %982 }
 0x700   :  { %v998_v58 = vsel %vm238_vm2, %v996_v55, %v983_v54 }
 0x701   :  { %v993_v56 = vpop.permute.xlu1 %992 }
 0x702   :  { %v1002_v62 = vsel %vm1000_vm3, %v999_v60, %v993_v56 }
 0x703   :  { %v991_v59 = vpop.permute.xlu0 %990 }
 0x704   :  { %v1001_v61 = vsel %vm1000_vm3, %v998_v58, %v991_v59 }
 0x705   :  { %2864 = vmatprep.mubr.msk.f32.mxu0 %vm66_vm0, %v1001_v61  ;;  %v1131_v61 = vsub.s32 3, %v3208_v7 }
 0x706   :  { %2865 = vmatmul.mubr.msk.f32.vlgmr.msra.gmra.mxu0 %vm66_vm0, %v1002_v62 }
 0x707   :  { %2879 = vmatpush3.msra.mxu0 %v39_v11  ;;  %v1132_v62 = vrot.slane %v3214_v9, %v1131_v61 }
 0x708   :  { %2880 = vmatprep.subr.mxu0 %v38_v13 }
 0x709   :  { %2881 = vmatpush3.msra.mxu0 %v38_v13 }
 0x7c6   :  { %v2866_v0 = vpop.f32.mrf.mxu0 }
 0x7c7   :  { %v1085_v1 = vadd.f32 %v2866_v0, %v1006_v63 }
 0x7c8   :  { %v1079_v35 = vpop.f32.mrf.mxu0 }
 0x7c9   :  { %v1080_v3 = vadd.f32 %v1079_v35, %v1006_v63  ;;  %v1089_v4 = vadd.f32 %v1085_v1, %v3204_v5  ;;  %v37_v5 = vld [vmem:[%s3751_s2 + $0x48] sm:$0xff] }
 0x7ca   :  { %2882 = vmatprep.subr.mxu0 %v37_v5 }
 0x7cb   :  { %v1093_v6 = vsel %vm66_vm0, %v1089_v4, 0.0  ;;  %v1088_v8 = vadd.f32 %v1080_v3, %v3191_v2  ;;  %v22_v2 = vld [vmem:[%s3749_s0 + $0x10] sm:$0xff]  ;;  %2883 = vmatpush3.msra.mxu0 %v37_v5 }
 0x7cc   :  { %1094 = vadd.xlane.f32.xlu1 %v1093_v6  ;;  %2886 = vmatprep.mubr.msk.f32.mxu0 %vm66_vm0, %v22_v2 }
 0x7cd   :  { %v1090_v10 = vsel %vm66_vm0, %v1088_v8, 0.0 }
 0x7ce   :  { %1091 = vadd.xlane.f32.xlu0 %v1090_v10 }
 0x7dd   :  { %1317 = vrot.lane.b32.xlu1 %v3255_v23, %s3143_s17  ;;  %v36_v23 = vld [vmem:[%s3751_s2 + $0x40] sm:$0xff] }
 0x7de   :  { %2884 = vmatprep.subr.mxu0 %v36_v23 }
 0x7df   :  { %2885 = vmatpush3.msra.mxu0 %v36_v23 }
 0x7e0   :  { %2887 = vmatmul.mubr.msk.f32.vlgmr.msra.gmra.mxu0 %vm66_vm0, %v23_v15 }
 0x7e1   :  { %2889 = vmatprep.mubr.msk.f32.mxu0 %vm66_vm0, %v24_v16 }
 0x7e4   :  { %2890 = vmatmul.mubr.msk.f32.gmra.mxu0 %vm66_vm0, %v25_v17 }
 0x855   :  { %v1095_v18 = vpop.xlane.xlu1 %1094 }
 0x856   :  { %v1098_v19 = vmul.f32 0.03125, %v1095_v18 }
 0x857   :  { %v1092_v12 = vpop.xlane.xlu0 %1091 }
 0x858   :  { %v1097_v14 = vmul.f32 0.03125, %v1092_v12  ;;  %v1100_v20 = vsub.f32 %v1089_v4, %v1098_v19 }
 0x859   :  { %v3473_v4 = vpop.permute.xlu1 %1317 }
 0x85a   :  { %v1099_v22 = vsub.f32 %v1088_v8, %v1097_v14  ;;  %v1102_v26 = vmul.f32 %v1100_v20, %v1100_v20 }
 0x85c   :  { %v1101_v24 = vmul.f32 %v1099_v22, %v1099_v22  ;;  %v1106_v27 = vsel %vm66_vm0, %v1102_v26, 0.0 }
 0x85e   :  { %v1103_v25 = vsel %vm66_vm0, %v1101_v24, 0.0 }
 0x85f   :  { %1104 = vadd.xlane.f32.xlu0 %v1103_v25 }
 0x863   :  { %1107 = vadd.xlane.f32.xlu0 %v1106_v27 }
 0x879   :  { %1319 = vrot.lane.b32.xlu0 %v3250_v21, %s3143_s17  ;;  %v32_v21 = vld [vmem:[%s3751_s2 + $0x20] sm:$0xff] }
 0x87a   :  { %2873 = vmatprep.subr.mxu1 %v32_v21 }
 0x87b   :  { %2874 = vmatpush3.msra.mxu1 %v32_v21 }
 0x8a0   :  { %v2888_v33 = vpop.f32.mrf.mxu0 }
 0x8a1   :  { %v3417_v34 = vadd.f32 %v2888_v33, %v1217_v32 }
 0x8a2   :  { %v1296_v37 = vpop.f32.mrf.mxu0 }
 0x8a3   :  { %v3419_v38 = vadd.f32 %v1296_v37, %v1217_v32 }
 0x8a4   :  { %v2891_v39 = vpop.f32.mrf.mxu0 }
 0x8a5   :  { %v3421_v40 = vadd.f32 %v2891_v39, %v1217_v32 }
 0x8a6   :  { %v1306_v57 = vpop.f32.mrf.mxu0 }
 0x8a7   :  { %2892 = vmatprep.subr.msk.mxu1 %vm154_vm1, %v3421_v40  ;;  %v3443_v60 = vadd.f32 %v1306_v57, %v1217_v32 }
 0x8e8   :  { %v1105_v41 = vpop.xlane.xlu0 %1104 }
 0x8e9   :  { %v1109_v42 = vmul.f32 0.03125, %v1105_v41 }
 0x8eb   :  { %v1111_v43 = vadd.f32 1e-05, %v1109_v42 }
 0x8ec   :  { %v1108_v44 = vpop.xlane.xlu0 %1107 }
 0x8ed   :  { %3069 = vrsqrt.f32 %v1111_v43  ;;  %v1110_v45 = vmul.f32 0.03125, %v1108_v44 }
 0x8ef   :  { %v1112_v46 = vadd.f32 1e-05, %v1110_v45 }
 0x8f0   :  { %v3471_v35 = vpop.permute.xlu0 %1319 }
 0x8f1   :  { %3071 = vrsqrt.f32 %v1112_v46 }
 0x8fa   :  { %v3070_v50 = vpop.eup %3069 }
 0x8fb   :  { %v1115_v51 = vmul.f32 %v3070_v50, %v1099_v22 }
 0x8fd   :  { %v1121_v53 = vmul.f32 %v3428_v49, %v1115_v51 }
 0x8fe   :  { %v3072_v54 = vpop.eup %3071 }
 0x8ff   :  { %v1116_v55 = vmul.f32 %v3072_v54, %v1100_v20  ;;  %v3435_v56 = vadd.f32 %v3431_v52, %v1121_v53 }
 0x901   :  { %2875 = vmatprep.mubr.msk.f32.mxu1 %vm66_vm0, %v3435_v56  ;;  %v1122_v58 = vmul.f32 %v3428_v49, %v1116_v55 }
 0x903   :  { %v3441_v59 = vadd.f32 %v3431_v52, %v1122_v58 }
 0x905   :  { %2876 = vmatmul.mubr.msk.f32.vlgmr.msra.gmra.mxu1 %vm66_vm0, %v3441_v59 }
 0x906   :  { %2893 = vmatpush3.xpose.msk.msra.mxu1 %vm154_vm1, %v3421_v40 }
 0x907   :  { %2894 = vmatprep.subr.msk.mxu1 %vm154_vm1, %v3443_v60 }
 0x90a   :  { %2895 = vmatpush3.xpose.msk.msra.mxu1 %vm154_vm1, %v3443_v60 }
 0x90b   :  { %2896 = vmatprep.subr.msk.mxu1 %vm154_vm1, %v3417_v34 }
 0x90e   :  { %2897 = vmatpush3.xpose.msk.msra.mxu1 %vm154_vm1, %v3417_v34 }
 0x90f   :  { %2898 = vmatprep.subr.msk.mxu1 %vm154_vm1, %v3419_v38 }
 0x912   :  { %2899 = vmatpush3.xpose.msk.msra.mxu1 %vm154_vm1, %v3419_v38 }
 0x9c5   :  { %v2877_v36 = vpop.f32.mrf.mxu1 }
 0x9c6   :  { %v3465_v1 = vadd.f32 %v2877_v36, %v1132_v62 }
 0x9c7   :  { %v1205_v63 = vpop.f32.mrf.mxu1 }
 0x9c8   :  { %v3463_v0 = vadd.f32 %v1205_v63, %v1132_v62 }
 0x9ca   :  { %2900 = vmatprep.mubr.msk.f32.mxu1 %vm154_vm1, %v3463_v0 }
 0x9cb   :  { %2901 = vmatmul.mubr.msk.f32.vlgmr.msra.gmra.mxu1 %vm154_vm1, %v3465_v1 }
 0xa8b   :  { %v2902_v3 = vpop.f32.mrf.mxu1 }
 0xa8c   :  { %v1413_v6 = vadd.f32 %v2902_v3, %v3471_v35 }
 0xa8d   :  { %v1407_v9 = vpop.f32.mrf.mxu1 }
 0xa8e   :  { %v1408_v8 = vadd.f32 %v1407_v9, %v3473_v4  ;;  %v1419_v10 = vsel %vm66_vm0, %v1413_v6, -inf }
 0xa8f   :  { %1420 = vmax.xlane.f32.xlu0 %v1419_v10 }
 0xa90   :  { %v1416_v11 = vsel %vm66_vm0, %v1408_v8, -inf }
 0xa91   :  { %1417 = vmax.xlane.f32.xlu1 %v1416_v11 }
 0xaa2   :  { %1450 = vrot.lane.b32.xlu1 %v3421_v40, %s3137_s8 }
 0xaa6   :  { %1446 = vrot.lane.b32.xlu1 %v3417_v34, %s3137_s8 }
 0xb18   :  { %v1421_v13 = vpop.xlane.xlu0 %1420 }
 0xb19   :  { %v1423_v2 = vsub.f32 %v1413_v6, %v1421_v13 }
 0xb1a   :  { %v1418_v5 = vpop.xlane.xlu1 %1417 }
 0xb1b   :  { %v1426_v23 = vmul.f32 1.442695, %v1423_v2  ;;  %v1422_v15 = vsub.f32 %v1408_v8, %v1418_v5 }
 0xb1d   :  { %3073 = vpow2.f32 %v1426_v23  ;;  %v1424_v16 = vmul.f32 1.442695, %v1422_v15 }
 0xb1e   :  { %v1451_v17 = vpop.permute.xlu1 %1450 }
 0xb1f   :  { %3075 = vpow2.f32 %v1424_v16  ;;  %2903 = vmatprep.subr.mxu0 %v1451_v17 }
 0xb20   :  { %2904 = vmatpush3.msra.mxu0 %v1451_v17 }
 0xb22   :  { %v1447_v20 = vpop.permute.xlu1 %1446 }
 0xb2a   :  { %v3074_v18 = vpop.eup %3073 }
 0xb2b   :  { %v1431_v19 = vsel %vm66_vm0, %v3074_v18, 0.0 }
 0xb2c   :  { %v3076_v12 = vpop.eup %3075  ;;  %1432 = vadd.xlane.f32.xlu0 %v1431_v19 }
 0xb2d   :  { %v1428_v14 = vsel %vm66_vm0, %v3076_v12, 0.0 }
 0xb2e   :  { %1429 = vadd.xlane.f32.xlu1 %v1428_v14 }
 0xb3f   :  { %1444 = vrot.lane.b32.xlu1 %v3419_v38, %s3137_s8 }
 0xb42   :  { %1448 = vrot.lane.b32.xlu0 %v3443_v60, %s3137_s8 }
 0xb43   :  { %1545 = vrot.lane.b32.xlu1 %v3443_v60, %s3138_s9 }
 0xb46   :  { %1547 = vrot.lane.b32.xlu0 %v3421_v40, %s3138_s9 }
 0xb47   :  { %1541 = vrot.lane.b32.xlu1 %v3419_v38, %s3138_s9 }
 0xb4a   :  { %1543 = vrot.lane.b32.xlu0 %v3417_v34, %s3138_s9 }
 0xb4b   :  { %1539 = vrot.lane.b32.xlu1 %v3465_v1, %s3138_s9 }
 0xb4e   :  { %1537 = vrot.lane.b32.xlu0 %v3463_v0, %s3138_s9 }
 0xbb5   :  { %v1433_v22 = vpop.xlane.xlu0 %1432 }
 0xbb6   :  { %3077 = vrcp.f32 %v1433_v22 }
 0xbb7   :  { %v1430_v24 = vpop.xlane.xlu1 %1429 }
 0xbb8   :  { %3079 = vrcp.f32 %v1430_v24 }
 0xbb9   :  { %v1449_v25 = vpop.permute.xlu0 %1448 }
 0xbba   :  { %2905 = vmatprep.subr.mxu0 %v1449_v25 }
 0xbbb   :  { %2906 = vmatpush3.msra.mxu0 %v1449_v25  ;;  %v1445_v26 = vpop.permute.xlu1 %1444 }
 0xbbc   :  { %2907 = vmatprep.subr.mxu0 %v1447_v20 }
 0xbbd   :  { %2908 = vmatpush3.msra.mxu0 %v1447_v20  ;;  %v1548_v27 = vpop.permute.xlu0 %1547 }
 0xbbe   :  { %2909 = vmatprep.subr.mxu0 %v1445_v26 }
 0xbbf   :  { %2910 = vmatpush3.msra.mxu0 %v1445_v26  ;;  %v1546_v44 = vpop.permute.xlu1 %1545 }
 0xbc0   :  { %2914 = vmatprep.subr.msk.mxu0 %vm154_vm1, %v1548_v27 }
 0xbc1   :  { %v1544_v37 = vpop.permute.xlu0 %1543 }
 0xbc3   :  { %v3078_v28 = vpop.eup %3077  ;;  %v1542_v45 = vpop.permute.xlu1 %1541 }
 0xbc4   :  { %v1437_v29 = vmul.f32 %v3078_v28, %v1433_v22 }
 0xbc5   :  { %v3080_v30 = vpop.eup %3079  ;;  %v1538_v43 = vpop.permute.xlu0 %1537 }
 0xbc6   :  { %v1439_v21 = vsub.f32 2.0, %v1437_v29  ;;  %v1436_v31 = vmul.f32 %v3080_v30, %v1430_v24 }
 0xbc7   :  { %v1540_v46 = vpop.permute.xlu1 %1539 }
 0xbc8   :  { %v1441_v32 = vmul.f32 %v3078_v28, %v1439_v21  ;;  %v1438_v33 = vsub.f32 2.0, %v1436_v31 }
 0xbca   :  { %v1443_v39 = vmul.f32 %v3074_v18, %v1441_v32  ;;  %v1440_v41 = vmul.f32 %v3080_v30, %v1438_v33 }
 0xbcc   :  { %2313 = vst.msk [vmem:[%s3754_s5 + $0x8] sm:$0xff] %vm66_vm0, %v1443_v39  ;;  %v1442_v42 = vmul.f32 %v3076_v12, %v1440_v41 }
 0xbce   :  { %2312 = vst.msk [vmem:[%s3754_s5] sm:$0xff] %vm66_vm0, %v1442_v42  ;;  %2911 = vmatprep.mubr.msk.f32.mxu0 %vm66_vm0, %v1442_v42 }
 0xbcf   :  { %2912 = vmatmul.mubr.msk.f32.vlgmr.msra.gmra.mxu0 %vm66_vm0, %v1443_v39 }
 0xbd0   :  { %2915 = vmatpush3.xpose.msk.msra.mxu0 %vm154_vm1, %v1548_v27  ;;  %2922 = vmatprep.mubr.msk.f32.mxu0 %vm154_vm1, %v1538_v43 }
 0xbd1   :  { %2916 = vmatprep.subr.msk.mxu0 %vm154_vm1, %v1546_v44 }
 0xbd4   :  { %2917 = vmatpush3.xpose.msk.msra.mxu0 %vm154_vm1, %v1546_v44 }
 0xbd5   :  { %2918 = vmatprep.subr.msk.mxu0 %vm154_vm1, %v1544_v37 }
 0xbd8   :  { %2919 = vmatpush3.xpose.msk.msra.mxu0 %vm154_vm1, %v1544_v37 }
 0xbd9   :  { %2920 = vmatprep.subr.msk.mxu0 %vm154_vm1, %v1542_v45 }
 0xbdc   :  { %2921 = vmatpush3.xpose.msk.msra.mxu0 %vm154_vm1, %v1542_v45 }
 0xbdf   :  { %2923 = vmatmul.mubr.msk.f32.vlgmr.msra.gmra.mxu0 %vm154_vm1, %v1540_v46 }
 0xc8f   :  { %v3521_v47 = vpop.f32.mrf.mxu0 }
 0xc91   :  { %v3523_v48 = vpop.f32.mrf.mxu0 }
 0xc9f   :  { %v2924_v50 = vpop.f32.mrf.mxu0 }
 0xca0   :  { %v1633_v51 = vadd.f32 %v2924_v50, %v3471_v35 }
 0xca1   :  { %v1627_v53 = vpop.f32.mrf.mxu0 }
 0xca2   :  { %v1628_v54 = vadd.f32 %v1627_v53, %v3473_v4  ;;  %v1639_v55 = vsel %vm66_vm0, %v1633_v51, -inf }
 0xca3   :  { %1640 = vmax.xlane.f32.xlu1 %v1639_v55 }
 0xca4   :  { %v1636_v57 = vsel %vm66_vm0, %v1628_v54, -inf }
 0xca5   :  { %1637 = vmax.xlane.f32.xlu0 %v1636_v57 }
 0xcb4   :  { %1670 = vrot.lane.b32.xlu1 %v3421_v40, %s3136_s7 }
 0xcb8   :  { %1666 = vrot.lane.b32.xlu1 %v3417_v34, %s3136_s7 }
 0xcbc   :  { %1664 = vrot.lane.b32.xlu1 %v3419_v38, %s3136_s7 }
 0xcc0   :  { %1765 = vrot.lane.b32.xlu1 %v3443_v60, %s3143_s17 }
 0xcc4   :  { %1761 = vrot.lane.b32.xlu1 %v3419_v38, %s3143_s17 }
 0xcc8   :  { %1759 = vrot.lane.b32.xlu1 %v3465_v1, %s3143_s17 }
 0xd2c   :  { %v1641_v58 = vpop.xlane.xlu1 %1640 }
 0xd2d   :  { %v1643_v61 = vsub.f32 %v1633_v51, %v1641_v58 }
 0xd2e   :  { %v1638_v62 = vpop.xlane.xlu0 %1637 }
 0xd2f   :  { %v1646_v36 = vmul.f32 1.442695, %v1643_v61  ;;  %v1642_v63 = vsub.f32 %v1628_v54, %v1638_v62 }
 0xd30   :  { %v1671_v3 = vpop.permute.xlu1 %1670 }
 0xd31   :  { %3081 = vpow2.f32 %v1646_v36  ;;  %v1644_v6 = vmul.f32 1.442695, %v1642_v63  ;;  %2925 = vmatprep.subr.mxu1 %v1671_v3 }
 0xd32   :  { %2926 = vmatpush3.msra.mxu1 %v1671_v3 }
 0xd33   :  { %3083 = vpow2.f32 %v1644_v6 }
 0xd34   :  { %v1667_v5 = vpop.permute.xlu1 %1666 }
 0xd38   :  { %v1665_v15 = vpop.permute.xlu1 %1664 }
 0xd3c   :  { %v1766_v29 = vpop.permute.xlu1 %1765 }
 0xd3e   :  { %v3082_v9 = vpop.eup %3081 }
 0xd3f   :  { %v1651_v8 = vsel %vm66_vm0, %v3082_v9, 0.0 }
 0xd40   :  { %v3084_v10 = vpop.eup %3083  ;;  %1652 = vadd.xlane.f32.xlu0 %v1651_v8  ;;  %v1762_v30 = vpop.permute.xlu1 %1761 }
 0xd41   :  { %v1648_v11 = vsel %vm66_vm0, %v3084_v10, 0.0 }
 0xd44   :  { %1649 = vadd.xlane.f32.xlu0 %v1648_v11  ;;  %v1760_v21 = vpop.permute.xlu1 %1759 }
 0xd5a   :  { %1668 = vrot.lane.b32.xlu0 %v3443_v60, %s3136_s7 }
 0xd5e   :  { %1767 = vrot.lane.b32.xlu0 %v3421_v40, %s3143_s17 }
 0xd62   :  { %1763 = vrot.lane.b32.xlu0 %v3417_v34, %s3143_s17 }
 0xd66   :  { %1757 = vrot.lane.b32.xlu0 %v3463_v0, %s3143_s17 }
 0xdc9   :  { %v1653_v13 = vpop.xlane.xlu0 %1652 }
 0xdca   :  { %3085 = vrcp.f32 %v1653_v13 }
 0xdcd   :  { %v1650_v2 = vpop.xlane.xlu0 %1649 }
 0xdce   :  { %3087 = vrcp.f32 %v1650_v2 }
 0xdd1   :  { %v1669_v23 = vpop.permute.xlu0 %1668 }
 0xdd2   :  { %2927 = vmatprep.subr.mxu1 %v1669_v23 }
 0xdd3   :  { %2928 = vmatpush3.msra.mxu1 %v1669_v23 }
 0xdd4   :  { %2929 = vmatprep.subr.mxu1 %v1667_v5 }
 0xdd5   :  { %2930 = vmatpush3.msra.mxu1 %v1667_v5  ;;  %v1768_v17 = vpop.permute.xlu0 %1767 }
 0xdd6   :  { %2931 = vmatprep.subr.mxu1 %v1665_v15 }
 0xdd7   :  { %v3086_v16 = vpop.eup %3085  ;;  %2932 = vmatpush3.msra.mxu1 %v1665_v15 }
 0xdd8   :  { %v1657_v18 = vmul.f32 %v3086_v16, %v1653_v13  ;;  %2936 = vmatprep.subr.msk.mxu1 %vm154_vm1, %v1768_v17 }
 0xdd9   :  { %v1764_v25 = vpop.permute.xlu0 %1763 }
 0xdda   :  { %v1659_v19 = vsub.f32 2.0, %v1657_v18 }
 0xddb   :  { %v3088_v12 = vpop.eup %3087 }
 0xddc   :  { %v1661_v14 = vmul.f32 %v3086_v16, %v1659_v19  ;;  %v1656_v20 = vmul.f32 %v3088_v12, %v1650_v2 }
 0xddd   :  { %v1758_v28 = vpop.permute.xlu0 %1757 }
 0xdde   :  { %v1663_v22 = vmul.f32 %v3082_v9, %v1661_v14  ;;  %v1658_v24 = vsub.f32 2.0, %v1656_v20 }
 0xde0   :  { %2651 = vst.msk [vmem:[%s3754_s5 + $0x18] sm:$0xff] %vm66_vm0, %v1663_v22  ;;  %v1660_v26 = vmul.f32 %v3088_v12, %v1658_v24 }
 0xde2   :  { %v1662_v27 = vmul.f32 %v3084_v10, %v1660_v26 }
 0xde4   :  { %2650 = vst.msk [vmem:[%s3754_s5 + $0x10] sm:$0xff] %vm66_vm0, %v1662_v27  ;;  %2933 = vmatprep.mubr.msk.f32.mxu1 %vm66_vm0, %v1662_v27 }
 0xde5   :  { %2934 = vmatmul.mubr.msk.f32.vlgmr.msra.gmra.mxu1 %vm66_vm0, %v1663_v22 }
 0xde6   :  { %2937 = vmatpush3.xpose.msk.msra.mxu1 %vm154_vm1, %v1768_v17  ;;  %2944 = vmatprep.mubr.msk.f32.mxu1 %vm154_vm1, %v1758_v28 }
 0xde7   :  { %2938 = vmatprep.subr.msk.mxu1 %vm154_vm1, %v1766_v29 }
 0xdea   :  { %2939 = vmatpush3.xpose.msk.msra.mxu1 %vm154_vm1, %v1766_v29 }
 0xdeb   :  { %2940 = vmatprep.subr.msk.mxu1 %vm154_vm1, %v1764_v25 }
 0xdee   :  { %2941 = vmatpush3.xpose.msk.msra.mxu1 %vm154_vm1, %v1764_v25 }
 0xdef   :  { %2942 = vmatprep.subr.msk.mxu1 %vm154_vm1, %v1762_v30 }
 0xdf2   :  { %2943 = vmatpush3.xpose.msk.msra.mxu1 %vm154_vm1, %v1762_v30 }
 0xdf5   :  { %2945 = vmatmul.mubr.msk.f32.vlgmr.msra.gmra.mxu1 %vm154_vm1, %v1760_v21 }
 0xea5   :  { %v3571_v31 = vpop.f32.mrf.mxu1 }
 0xea7   :  { %v3573_v32 = vpop.f32.mrf.mxu1 }
 0xeb5   :  { %v2946_v33 = vpop.f32.mrf.mxu1 }
 0xeb6   :  { %v1853_v37 = vadd.f32 %v2946_v33, %v3471_v35 }
 0xeb7   :  { %v1847_v39 = vpop.f32.mrf.mxu1 }
 0xeb8   :  { %v1848_v41 = vadd.f32 %v1847_v39, %v3473_v4  ;;  %v1859_v42 = vsel %vm66_vm0, %v1853_v37, -inf }
 0xeb9   :  { %1860 = vmax.xlane.f32.xlu1 %v1859_v42 }
 0xeba   :  { %v1856_v43 = vsel %vm66_vm0, %v1848_v41, -inf }
 0xebb   :  { %1857 = vmax.xlane.f32.xlu0 %v1856_v43 }
 0xeca   :  { %1890 = vrot.lane.b32.xlu1 %v3421_v40, %s3141_s15 }
 0xece   :  { %1886 = vrot.lane.b32.xlu1 %v3417_v34, %s3141_s15 }
 0xed2   :  { %1884 = vrot.lane.b32.xlu1 %v3419_v38, %s3141_s15 }
 0xed6   :  { %1985 = vrot.lane.b32.xlu1 %v3443_v60, %s3144_s18 }
 0xeda   :  { %1981 = vrot.lane.b32.xlu1 %v3419_v38, %s3144_s18 }
 0xede   :  { %1979 = vrot.lane.b32.xlu1 %v3465_v1, %s3144_s18 }
 0xf42   :  { %v1861_v44 = vpop.xlane.xlu1 %1860 }
 0xf43   :  { %v1863_v45 = vsub.f32 %v1853_v37, %v1861_v44 }
 0xf44   :  { %v1858_v46 = vpop.xlane.xlu0 %1857 }
 0xf45   :  { %v1866_v50 = vmul.f32 1.442695, %v1863_v45  ;;  %v1862_v51 = vsub.f32 %v1848_v41, %v1858_v46 }
 0xf46   :  { %v1891_v53 = vpop.permute.xlu1 %1890 }
 0xf47   :  { %3089 = vpow2.f32 %v1866_v50  ;;  %v1864_v54 = vmul.f32 1.442695, %v1862_v51  ;;  %2947 = vmatprep.subr.mxu0 %v1891_v53 }
 0xf48   :  { %2948 = vmatpush3.msra.mxu0 %v1891_v53 }
 0xf49   :  { %3091 = vpow2.f32 %v1864_v54 }
 0xf4a   :  { %v1887_v36 = vpop.permute.xlu1 %1886 }
 0xf4e   :  { %v1885_v3 = vpop.permute.xlu1 %1884 }
 0xf52   :  { %v1986_v18 = vpop.permute.xlu1 %1985 }
 0xf54   :  { %v3090_v55 = vpop.eup %3089 }
 0xf55   :  { %v1871_v57 = vsel %vm66_vm0, %v3090_v55, 0.0 }
 0xf56   :  { %v3092_v58 = vpop.eup %3091  ;;  %1872 = vadd.xlane.f32.xlu0 %v1871_v57  ;;  %v1982_v19 = vpop.permute.xlu1 %1981 }
 0xf57   :  { %v1868_v61 = vsel %vm66_vm0, %v3092_v58, 0.0 }
 0xf5a   :  { %1869 = vadd.xlane.f32.xlu0 %v1868_v61  ;;  %v1980_v12 = vpop.permute.xlu1 %1979  ;;  %v46_v61 = vld [vmem:[%s3751_s2 + $0x90] sm:$0xff] }
 0xf70   :  { %1888 = vrot.lane.b32.xlu0 %v3443_v60, %s3141_s15 }
 0xf74   :  { %1987 = vrot.lane.b32.xlu0 %v3421_v40, %s3144_s18 }
 0xf78   :  { %1983 = vrot.lane.b32.xlu0 %v3417_v34, %s3144_s18 }
 0xf7c   :  { %1977 = vrot.lane.b32.xlu0 %v3463_v0, %s3144_s18 }
 0xfdf   :  { %v1873_v1 = vpop.xlane.xlu0 %1872 }
 0xfe0   :  { %3093 = vrcp.f32 %v1873_v1 }
 0xfe3   :  { %v1870_v62 = vpop.xlane.xlu0 %1869 }
 0xfe4   :  { %3095 = vrcp.f32 %v1870_v62 }
 0xfe7   :  { %v1889_v63 = vpop.permute.xlu0 %1888 }
 0xfe8   :  { %2949 = vmatprep.subr.mxu0 %v1889_v63 }
 0xfe9   :  { %2950 = vmatpush3.msra.mxu0 %v1889_v63 }
 0xfea   :  { %2951 = vmatprep.subr.mxu0 %v1887_v36 }
 0xfeb   :  { %2952 = vmatpush3.msra.mxu0 %v1887_v36  ;;  %v1988_v9 = vpop.permute.xlu0 %1987 }
 0xfec   :  { %2953 = vmatprep.subr.mxu0 %v1885_v3 }
 0xfed   :  { %v3094_v6 = vpop.eup %3093  ;;  %2954 = vmatpush3.msra.mxu0 %v1885_v3 }
 0xfee   :  { %v1877_v8 = vmul.f32 %v3094_v6, %v1873_v1  ;;  %2958 = vmatprep.subr.msk.mxu0 %vm154_vm1, %v1988_v9  ;;  %v45_v1 = vld [vmem:[%s3751_s2 + $0x88] sm:$0xff] }
 0xfef   :  { %v1984_v23 = vpop.permute.xlu0 %1983 }
 0xff0   :  { %v1879_v10 = vsub.f32 2.0, %v1877_v8 }
 0xff1   :  { %v3096_v0 = vpop.eup %3095 }
 0xff2   :  { %v1881_v11 = vmul.f32 %v3094_v6, %v1879_v10  ;;  %v1876_v13 = vmul.f32 %v3096_v0, %v1870_v62  ;;  %v44_v62 = vld [vmem:[%s3751_s2 + $0x80] sm:$0xff] }
 0xff3   :  { %v1978_v17 = vpop.permute.xlu0 %1977 }
 0xff4   :  { %v1883_v2 = vmul.f32 %v3090_v55, %v1881_v11  ;;  %v1878_v5 = vsub.f32 2.0, %v1876_v13 }
 0xff6   :  { %2653 = vst.msk [vmem:[%s3754_s5 + $0x28] sm:$0xff] %vm66_vm0, %v1883_v2  ;;  %v1880_v15 = vmul.f32 %v3096_v0, %v1878_v5 }
 0xff8   :  { %v1882_v16 = vmul.f32 %v3092_v58, %v1880_v15  ;;  %v47_v58 = vld [vmem:[%s3751_s2 + $0x98] sm:$0xff] }
 0xffa   :  { %2652 = vst.msk [vmem:[%s3754_s5 + $0x20] sm:$0xff] %vm66_vm0, %v1882_v16  ;;  %2955 = vmatprep.mubr.msk.f32.mxu0 %vm66_vm0, %v1882_v16  ;;  %v2229_v16 = vsub.s32 6, %v3208_v7 }
 0xffb   :  { %2956 = vmatmul.mubr.msk.f32.vlgmr.msra.gmra.mxu0 %vm66_vm0, %v1883_v2 }
 0xffc   :  { %2959 = vmatpush3.xpose.msk.msra.mxu0 %vm154_vm1, %v1988_v9  ;;  %2966 = vmatprep.mubr.msk.f32.mxu0 %vm154_vm1, %v1978_v17 }
 0xffd   :  { %2960 = vmatprep.subr.msk.mxu0 %vm154_vm1, %v1986_v18 }
0x1000   :  { %2961 = vmatpush3.xpose.msk.msra.mxu0 %vm154_vm1, %v1986_v18 }
0x1001   :  { %2962 = vmatprep.subr.msk.mxu0 %vm154_vm1, %v1984_v23 }
0x1004   :  { %2963 = vmatpush3.xpose.msk.msra.mxu0 %vm154_vm1, %v1984_v23 }
0x1005   :  { %2964 = vmatprep.subr.msk.mxu0 %vm154_vm1, %v1982_v19 }
0x1008   :  { %2965 = vmatpush3.xpose.msk.msra.mxu0 %vm154_vm1, %v1982_v19 }
0x100b   :  { %2967 = vmatmul.mubr.msk.f32.vlgmr.msra.gmra.mxu0 %vm154_vm1, %v1980_v12 }
0x10bb   :  { %v2957_v14 = vpop.f32.mrf.mxu0 }
0x10bd   :  { %v1968_v20 = vpop.f32.mrf.mxu0 }
0x10cb   :  { %v2968_v22 = vpop.f32.mrf.mxu0 }
0x10cc   :  { %v2073_v24 = vadd.f32 %v2968_v22, %v3471_v35 }
0x10cd   :  { %v2067_v25 = vpop.f32.mrf.mxu0 }
0x10ce   :  { %v2068_v26 = vadd.f32 %v2067_v25, %v3473_v4  ;;  %v2079_v27 = vsel %vm66_vm0, %v2073_v24, -inf }
0x10cf   :  { %2080 = vmax.xlane.f32.xlu1 %v2079_v27 }
0x10d0   :  { %v2076_v28 = vsel %vm66_vm0, %v2068_v26, -inf }
0x10d1   :  { %2077 = vmax.xlane.f32.xlu0 %v2076_v28 }
0x10e0   :  { %2110 = vrot.lane.b32.xlu1 %v3421_v40, %s3142_s16 }
0x10e4   :  { %2106 = vrot.lane.b32.xlu1 %v3417_v34, %s3142_s16 }
0x10e8   :  { %2104 = vrot.lane.b32.xlu1 %v3419_v38, %s3142_s16 }
0x10ec   :  { %2201 = vrot.lane.b32.xlu1 %v3571_v31, %s3146_s20 }
0x10f0   :  { %2209 = vrot.lane.b32.xlu1 %v2957_v14, %s3148_s30 }
0x1158   :  { %v2081_v35 = vpop.xlane.xlu1 %2080 }
0x1159   :  { %v2083_v4 = vsub.f32 %v2073_v24, %v2081_v35 }
0x115a   :  { %v2078_v29 = vpop.xlane.xlu0 %2077 }
0x115b   :  { %v2086_v30 = vmul.f32 1.442695, %v2083_v4  ;;  %v2082_v21 = vsub.f32 %v2068_v26, %v2078_v29 }
0x115c   :  { %v2111_v33 = vpop.permute.xlu1 %2110 }
0x115d   :  { %3097 = vpow2.f32 %v2086_v30  ;;  %v2084_v37 = vmul.f32 1.442695, %v2082_v21  ;;  %2969 = vmatprep.subr.mxu1 %v2111_v33 }
0x115e   :  { %2970 = vmatpush3.msra.mxu1 %v2111_v33  ;;  %v50_v33 = vld [vmem:[%s3751_s2 + $0xb0] sm:$0xff] }
0x115f   :  { %3099 = vpow2.f32 %v2084_v37  ;;  %v49_v37 = vld [vmem:[%s3751_s2 + $0xa8] sm:$0xff] }
0x1160   :  { %v2107_v42 = vpop.permute.xlu1 %2106 }
0x1164   :  { %v2105_v44 = vpop.permute.xlu1 %2104 }
0x1168   :  { %v2202_v3 = vpop.permute.xlu1 %2201 }
0x1169   :  { %v2222_v11 = vsel %vm154_vm1, %v3521_v47, %v2202_v3 }
0x116a   :  { %v3098_v34 = vpop.eup %3097 }
0x116b   :  { %v2091_v40 = vsel %vm66_vm0, %v3098_v34, 0.0 }
0x116c   :  { %v3100_v38 = vpop.eup %3099  ;;  %2092 = vadd.xlane.f32.xlu0 %v2091_v40  ;;  %v2210_v9 = vpop.permute.xlu1 %2209  ;;  %v59_v40 = vld [vmem:[%s3751_s2 + $0xf8] sm:$0xff] }
0x116d   :  { %v2088_v31 = vsel %vm66_vm0, %v3100_v38, 0.0  ;;  %v2224_v5 = vsel %vm238_vm2, %v2222_v11, %v2210_v9  ;;  %v2658_v11 = vld [vmem:[%s3752_s3 + $0x8] ss:$0 sm:$0xff] }
0x1170   :  { %2089 = vadd.xlane.f32.xlu0 %v2088_v31  ;;  %v57_v31 = vld [vmem:[%s3751_s2 + $0xe8] sm:$0xff] }
0x1186   :  { %2108 = vrot.lane.b32.xlu0 %v3443_v60, %s3142_s16 }
0x118a   :  { %2199 = vrot.lane.b32.xlu0 %v3573_v32, %s3146_s20 }
0x118e   :  { %2207 = vrot.lane.b32.xlu0 %v1968_v20, %s3148_s30 }
0x11f5   :  { %v2093_v39 = vpop.xlane.xlu0 %2092 }
0x11f6   :  { %3101 = vrcp.f32 %v2093_v39 }
0x11f9   :  { %v2090_v41 = vpop.xlane.xlu0 %2089 }
0x11fa   :  { %3103 = vrcp.f32 %v2090_v41 }
0x11fd   :  { %v2109_v43 = vpop.permute.xlu0 %2108 }
0x11fe   :  { %2971 = vmatprep.subr.mxu1 %v2109_v43 }
0x11ff   :  { %2972 = vmatpush3.msra.mxu1 %v2109_v43 }
0x1200   :  { %2973 = vmatprep.subr.mxu1 %v2107_v42 }
0x1201   :  { %2974 = vmatpush3.msra.mxu1 %v2107_v42  ;;  %v2200_v6 = vpop.permute.xlu0 %2199 }
0x1202   :  { %2975 = vmatprep.subr.mxu1 %v2105_v44  ;;  %v2221_v10 = vsel %vm154_vm1, %v3523_v48, %v2200_v6  ;;  %v3679_v48 = vld [vmem:[%s3752_s3] sm:$0xff] }
0x1203   :  { %v3102_v45 = vpop.eup %3101  ;;  %2976 = vmatpush3.msra.mxu1 %v2105_v44  ;;  %v2230_v47 = vrot.slane %v3679_v48, %v2229_v16 }
0x1204   :  { %v2097_v60 = vmul.f32 %v3102_v45, %v2093_v39  ;;  %2980 = vmatprep.subr.mxu1 %v47_v58  ;;  %v56_v39 = vld [vmem:[%s3751_s2 + $0xe0] sm:$0xff] }
0x1205   :  { %v2208_v8 = vpop.permute.xlu0 %2207 }
0x1206   :  { %v2099_v46 = vsub.f32 2.0, %v2097_v60  ;;  %v2223_v13 = vsel %vm238_vm2, %v2221_v10, %v2208_v8 }
0x1207   :  { %v3104_v50 = vpop.eup %3103 }
0x1208   :  { %v2101_v32 = vmul.f32 %v3102_v45, %v2099_v46  ;;  %v2096_v51 = vmul.f32 %v3104_v50, %v2090_v41 }
0x120a   :  { %v2103_v53 = vmul.f32 %v3098_v34, %v2101_v32  ;;  %v2098_v54 = vsub.f32 2.0, %v2096_v51  ;;  %v48_v34 = vld [vmem:[%s3751_s2 + $0xa0] sm:$0xff] }
0x120c   :  { %2655 = vst.msk [vmem:[%s3754_s5 + $0x38] sm:$0xff] %vm66_vm0, %v2103_v53  ;;  %v2100_v55 = vmul.f32 %v3104_v50, %v2098_v54 }
0x120e   :  { %v2102_v57 = vmul.f32 %v3100_v38, %v2100_v55  ;;  %v58_v38 = vld [vmem:[%s3751_s2 + $0xf0] sm:$0xff] }
0x1210   :  { %2654 = vst.msk [vmem:[%s3754_s5 + $0x30] sm:$0xff] %vm66_vm0, %v2102_v57  ;;  %2977 = vmatprep.mubr.msk.f32.mxu1 %vm66_vm0, %v2102_v57 }
0x1211   :  { %2978 = vmatmul.mubr.msk.f32.vlgmr.msra.gmra.mxu1 %vm66_vm0, %v2103_v53 }
0x1212   :  { %2981 = vmatpush3.msra.mxu1 %v47_v58  ;;  %v55_v58 = vld [vmem:[%s3751_s2 + $0xd8] sm:$0xff] }
0x1213   :  { %2982 = vmatprep.subr.mxu1 %v46_v61 }
0x1214   :  { %2983 = vmatpush3.msra.mxu1 %v46_v61  ;;  %v54_v61 = vld [vmem:[%s3751_s2 + $0xd0] sm:$0xff] }
0x1215   :  { %2984 = vmatprep.subr.mxu1 %v45_v1 }
0x1216   :  { %2985 = vmatpush3.msra.mxu1 %v45_v1  ;;  %v53_v1 = vld [vmem:[%s3751_s2 + $0xc8] sm:$0xff] }
0x1217   :  { %2986 = vmatprep.subr.mxu1 %v44_v62 }
0x1218   :  { %2987 = vmatpush3.msra.mxu1 %v44_v62  ;;  %v52_v62 = vld [vmem:[%s3751_s2 + $0xc0] sm:$0xff] }
0x1219   :  { %3002 = vmatprep.subr.mxu1 %v59_v40 }
0x12d1   :  { %v2979_v36 = vpop.f32.mrf.mxu1 }
0x12d2   :  { %2217 = vrot.lane.b32.xlu1 %v2979_v36, %s3149_s6  ;;  %v2357_v36 = vsub.s32 7, %v3208_v7 }
0x12d3   :  { %v2188_v63 = vpop.f32.mrf.mxu1 }
0x12d4   :  { %2215 = vrot.lane.b32.xlu0 %v2188_v63, %s3149_s6  ;;  %v2358_v63 = vrot.slane %v3679_v48, %v2357_v36 }
0x1344   :  { %v2218_v0 = vpop.permute.xlu1 %2217 }
0x1345   :  { %v2226_v15 = vsel %vm1000_vm3, %v2224_v5, %v2218_v0 }
0x1346   :  { %v2216_v2 = vpop.permute.xlu0 %2215 }
0x1347   :  { %v2225_v23 = vsel %vm1000_vm3, %v2223_v13, %v2216_v2 }
0x1348   :  { %2988 = vmatprep.mubr.msk.f32.mxu1 %vm66_vm0, %v2225_v23 }
0x1349   :  { %2989 = vmatmul.mubr.msk.f32.vlgmr.msra.gmra.mxu1 %vm66_vm0, %v2226_v15 }
0x134a   :  { %3003 = vmatpush3.msra.mxu1 %v59_v40 }
0x134b   :  { %3004 = vmatprep.subr.mxu1 %v58_v38 }
0x134c   :  { %3005 = vmatpush3.msra.mxu1 %v58_v38 }
0x134d   :  { %3006 = vmatprep.subr.mxu1 %v57_v31 }
0x134e   :  { %3007 = vmatpush3.msra.mxu1 %v57_v31 }
0x134f   :  { %3008 = vmatprep.subr.mxu1 %v56_v39 }
0x1350   :  { %3009 = vmatpush3.msra.mxu1 %v56_v39 }
0x1351   :  { %3010 = vmatprep.subr.mxu1 %v55_v58 }
0x1352   :  { %3011 = vmatpush3.msra.mxu1 %v55_v58 }
0x1353   :  { %3012 = vmatprep.subr.mxu1 %v54_v61 }
0x1354   :  { %3013 = vmatpush3.msra.mxu1 %v54_v61 }
0x1355   :  { %3014 = vmatprep.subr.mxu1 %v53_v1 }
0x1356   :  { %3015 = vmatpush3.msra.mxu1 %v53_v1 }
0x1357   :  { %3016 = vmatprep.subr.mxu1 %v52_v62 }
0x1358   :  { %3017 = vmatpush3.msra.mxu1 %v52_v62 }
0x1409   :  { %v2990_v17 = vpop.f32.mrf.mxu1 }
0x140a   :  { %v2309_v18 = vadd.f32 %v2990_v17, %v2230_v47 }
0x140b   :  { %v2303_v19 = vpop.f32.mrf.mxu1 }
0x140c   :  { %v2324_v12 = vadd.f32 %v2309_v18, %v3441_v59  ;;  %v2304_v14 = vadd.f32 %v2303_v19, %v2230_v47 }
0x140e   :  { %v2323_v20 = vadd.f32 %v2304_v14, %v3435_v56  ;;  %v2328_v22 = vsel %vm66_vm0, %v2324_v12, 0.0  ;;  %v51_v56 = vld [vmem:[%s3751_s2 + $0xb8] sm:$0xff]  ;;  %s3150_s2 = smov [#allocation2]  }
0x140f   :  { %2329 = vadd.xlane.f32.xlu1 %v2328_v22  ;;  %2991 = vmatprep.subr.mxu0 %v51_v56  ;;  %s2567_s3 = sshll.u32 %s3150_s2, 4  ;;  %s2568_s3 = int_to_ptr.vmem [resolvable:$true] %s2567_s3 }
0x1410   :  { %v2325_v24 = vsel %vm66_vm0, %v2323_v20, 0.0  ;;  %2992 = vmatpush3.msra.mxu0 %v51_v56  ;;  %s3114_s14 = scalar_lea.vmem %s2568_s3, 256  ;;  %p3119_p1 = scmp.lt.s32.totalorder %s2568_s3, %s2568_s3 }
0x1411   :  { %2326 = vadd.xlane.f32.xlu0 %v2325_v24  ;;  %2993 = vmatprep.subr.mxu0 %v50_v33  ;;  %p3115_p0 = scmp.ne.s32.totalorder %s2568_s3, %s3114_s14  ;;  %p3120_p2 = scmp.lt.s32.totalorder %s3114_s14, %s3114_s14 }
0x1412   :  { %2994 = vmatpush3.msra.mxu0 %v50_v33 }
0x1413   :  { %2995 = vmatprep.subr.mxu0 %v49_v37  ;;  %p3121_p3 = por %p3120_p2, %p3119_p1 }
0x1414   :  { %2996 = vmatpush3.msra.mxu0 %v49_v37 }
0x1415   :  { %2997 = vmatprep.subr.mxu0 %v48_v34  ;;  %p3122_p4 = pnand %p3121_p3, %p3115_p0 }
0x1416   :  { %2998 = vmatpush3.msra.mxu0 %v48_v34 }
0x1498   :  { %v2330_v25 = vpop.xlane.xlu1 %2329 }
0x1499   :  { %v2332_v26 = vmul.f32 0.03125, %v2330_v25 }
0x149a   :  { %v2327_v27 = vpop.xlane.xlu0 %2326 }
0x149b   :  { %v2331_v28 = vmul.f32 0.03125, %v2327_v27  ;;  %v2334_v35 = vsub.f32 %v2324_v12, %v2332_v26 }
0x149d   :  { %v2333_v4 = vsub.f32 %v2323_v20, %v2331_v28  ;;  %v2336_v21 = vmul.f32 %v2334_v35, %v2334_v35 }
0x149f   :  { %v2335_v29 = vmul.f32 %v2333_v4, %v2333_v4  ;;  %v2340_v59 = vsel %vm66_vm0, %v2336_v21, 0.0 }
0x14a1   :  { %v2337_v30 = vsel %vm66_vm0, %v2335_v29, 0.0 }
0x14a2   :  { %2338 = vadd.xlane.f32.xlu0 %v2337_v30 }
0x14a6   :  { %2341 = vadd.xlane.f32.xlu0 %v2340_v59 }
0x152b   :  { %v2339_v41 = vpop.xlane.xlu0 %2338 }
0x152c   :  { %v2343_v42 = vmul.f32 0.03125, %v2339_v41 }
0x152e   :  { %v2345_v43 = vadd.f32 1e-05, %v2343_v42 }
0x152f   :  { %v2342_v44 = vpop.xlane.xlu0 %2341 }
0x1530   :  { %3105 = vrsqrt.f32 %v2345_v43  ;;  %v2344_v45 = vmul.f32 0.03125, %v2342_v44 }
0x1532   :  { %v2346_v60 = vadd.f32 1e-05, %v2344_v45 }
0x1534   :  { %3107 = vrsqrt.f32 %v2346_v60 }
0x153d   :  { %v3106_v46 = vpop.eup %3105 }
0x153e   :  { %v2349_v50 = vmul.f32 %v3106_v46, %v2333_v4 }
0x1540   :  { %v2351_v32 = vmul.f32 %v2349_v50, %v3428_v49 }
0x1541   :  { %v3108_v51 = vpop.eup %3107 }
0x1542   :  { %v2350_v53 = vmul.f32 %v3108_v51, %v2334_v35  ;;  %v2353_v54 = vadd.f32 %v2351_v32, %v3431_v52 }
0x1544   :  { %2999 = vmatprep.mubr.msk.f32.mxu0 %vm66_vm0, %v2353_v54  ;;  %v2352_v55 = vmul.f32 %v2350_v53, %v3428_v49 }
0x1546   :  { %v2354_v57 = vadd.f32 %v2352_v55, %v3431_v52 }
0x1548   :  { %3000 = vmatmul.mubr.msk.f32.vlgmr.msra.gmra.mxu0 %vm66_vm0, %v2354_v57 }
0x1608   :  { %v3001_v3 = vpop.f32.mrf.mxu0 }
0x1609   :  { %v2437_v6 = vadd.f32 %v3001_v3, %v2358_v63 }
0x160a   :  { %v2431_v9 = vpop.f32.mrf.mxu0 }
0x160b   :  { %v2432_v8 = vadd.f32 %v2431_v9, %v2358_v63  ;;  %v2441_v0 = vmax.f32 %v2437_v6, 0.0 }
0x160d   :  { %v2440_v10 = vmax.f32 %v2432_v8, 0.0 }
0x160f   :  { %3018 = vmatprep.mubr.msk.f32.mxu1 %vm2446_vm4, %v2440_v10 }
0x1610   :  { %3019 = vmatmul.mubr.msk.f32.vlgmr.msra.gmra.mxu1 %vm2446_vm4, %v2441_v0 }
0x16d0   :  { %v3020_v13 = vpop.f32.mrf.mxu1 }
0x16d1   :  { %v2525_v2 = vadd.f32 %v3020_v13, %v2658_v11 }
0x16d2   :  { %v2519_v5 = vpop.f32.mrf.mxu1 }
0x16d3   :  { %v2529_v23 = vadd.f32 %v2525_v2, %v2354_v57  ;;  %v2520_v7 = vadd.f32 %v2658_v11, %v2519_v5 }
0x16d5   :  { %v2528_v15 = vadd.f32 %v2520_v7, %v2353_v54  ;;  %v2533_v16 = vsel %vm66_vm0, %v2529_v23, 0.0 }
0x16d6   :  { %2534 = vadd.xlane.f32.xlu0 %v2533_v16 }
0x16d7   :  { %v2530_v48 = vsel %vm66_vm0, %v2528_v15, 0.0 }
0x16d8   :  { %2531 = vadd.xlane.f32.xlu1 %v2530_v48 }
0x175f   :  { %v2535_v47 = vpop.xlane.xlu0 %2534 }
0x1760   :  { %v2537_v17 = vmul.f32 0.03125, %v2535_v47 }
0x1761   :  { %v2532_v18 = vpop.xlane.xlu1 %2531 }
0x1762   :  { %v2539_v19 = vsub.f32 %v2529_v23, %v2537_v17  ;;  %v2536_v12 = vmul.f32 0.03125, %v2532_v18 }
0x1764   :  { %v2538_v14 = vsub.f32 %v2528_v15, %v2536_v12  ;;  %v2541_v20 = vmul.f32 %v2539_v19, %v2539_v19 }
0x1766   :  { %v2545_v22 = vsel %vm66_vm0, %v2541_v20, 0.0  ;;  %v2540_v24 = vmul.f32 %v2538_v14, %v2538_v14 }
0x1767   :  { %2546 = vadd.xlane.f32.xlu0 %v2545_v22 }
0x1768   :  { %v2542_v25 = vsel %vm66_vm0, %v2540_v24, 0.0 }
0x1769   :  { %2543 = vadd.xlane.f32.xlu1 %v2542_v25 }
0x17f0   :  { %v2547_v26 = vpop.xlane.xlu0 %2546 }
0x17f1   :  { %v2549_v27 = vmul.f32 0.03125, %v2547_v26 }
0x17f2   :  { %v2544_v28 = vpop.xlane.xlu1 %2543 }
0x17f3   :  { %v2551_v35 = vadd.f32 1e-05, %v2549_v27  ;;  %v2548_v4 = vmul.f32 0.03125, %v2544_v28 }
0x17f5   :  { %3109 = vrsqrt.f32 %v2551_v35  ;;  %v2550_v29 = vadd.f32 1e-05, %v2548_v4 }
0x17f7   :  { %3111 = vrsqrt.f32 %v2550_v29 }
0x1802   :  { %v3110_v30 = vpop.eup %3109 }
0x1803   :  { %v2555_v21 = vmul.f32 %v3110_v30, %v2539_v19 }
0x1804   :  { %v3112_v59 = vpop.eup %3111 }
0x1805   :  { %v2554_v56 = vmul.f32 %v3112_v59, %v2538_v14  ;;  %v2557_v33 = vmul.f32 %v2555_v21, %v3428_v49 }
0x1807   :  { %v2556_v37 = vmul.f32 %v2554_v56, %v3428_v49  ;;  %v2559_v34 = vadd.f32 %v2557_v33, %v3431_v52 }
0x1809   :  { %v2558_v40 = vadd.f32 %v2556_v37, %v3431_v52  ;;  %2561 = vst.msk [vmem:[#allocation2 + $0x8] sm:$0xff] %vm66_vm0, %v2559_v34 }
0x180b   :  { %2560 = vst.msk [vmem:[#allocation2] sm:$0xff] %vm66_vm0, %v2558_v40 }
0x180c   :  { %3125 = shalt.err (!%p3122_p4)
}
0x180d   :  { %s3151_s19 = smov 128  }
0x180e   :  { %2573 = dma.vmem_to_hbm [thread:$0]  %s2568_s3, 256, %s3753_s4, [#allocation3], %s3151_s19, %s3151_s19, %s3146_s20  }
0x180f   :  { %3134 = dma.done.wait [#allocation3], 256  }
0x1810   :  { %3135 = vsyncadd [#allocation3], 4294967040 }
0x1811   :  { %2581 = vsyncpa [#allocation3], 1 }

</bundles_post_ra>
